<compile_context>
chip_gen: v6e
topology: v6e:2x2x1
jax: 0.10.0
libtpu: 0.0.40
codegen_flags: <defaults>
</compile_context>

<pallas_src>
import functools

import jax
import jax.numpy as jnp
from jax import lax
from jax.experimental import pallas as pl
from jax.experimental.pallas import tpu as pltpu

_MXU_DTYPE = jnp.bfloat16   # bf16 operands + f32 accumulation for all MLP matmuls
_LANE = 128


def _round_up(x, m):
    return ((x + m - 1) // m) * m


def _pick_batch_tile(batch, preferred):
    """Largest 8-aligned tile <= preferred that divides the batch."""
    if batch <= preferred:
        return batch
    for t in (preferred, 256, 128, 64, 32, 16, 8):
        if t <= batch and batch % t == 0:
            return t
    return batch  # TODO(synk): ragged batch -> fall back to a single whole-batch tile


# ----------------------------------------------------------------------------
# Fused, batch-tiled kernel
# ----------------------------------------------------------------------------
def _fused_kernel(
    # inputs (streamed tiles + resident weights)
    x1_ref, x2_ref,
    e1w_ref, e1b_ref, e2w_ref, e2b_ref,
    d1w_ref, d1b_ref, d2w_ref, d2b_ref,
    p1w_ref, p1b_ref, p2w_ref, p2b_ref,
    # outputs
    z1_ref, z2_ref, r1_ref, r2_ref, loss_ref,
    # scratch accumulators (persist across grid steps)
    gram_ref, s1_ref, q1_ref, s2_ref, q2_ref,
    *, n_total, lambd, scale_factor, eps,
):
    step = pl.program_id(0)
    last = pl.num_programs(0) - 1

    @pl.when(step == 0)
    def _init():
        gram_ref[...] = jnp.zeros_like(gram_ref)
        s1_ref[...] = jnp.zeros_like(s1_ref)
        q1_ref[...] = jnp.zeros_like(q1_ref)
        s2_ref[...] = jnp.zeros_like(s2_ref)
        q2_ref[...] = jnp.zeros_like(q2_ref)
        loss_ref[0, 0] = jnp.float32(0.0)

    def dense(v_bf16, w_ref, b_ref, relu):
        """y = v @ W + b on the MXU (bf16 operands, f32 accumulation)."""
        y = lax.dot_general(
            v_bf16, w_ref[...],
            dimension_numbers=(((1,), (0,)), ((), ())),
            preferred_element_type=jnp.float32,
        ) + b_ref[...]
        if relu:
            # Cast to bf16 exactly once (next layer's MXU operand dtype).
            return jnp.maximum(y, 0.0).astype(_MXU_DTYPE)
        return y  # output layers stay f32

    def forward_view(x_tile_f32):
        xb = x_tile_f32.astype(_MXU_DTYPE)
        h = dense(xb, e1w_ref, e1b_ref, relu=True)
        z = dense(h, e2w_ref, e2b_ref, relu=False)        # (tb, latent_pad) f32
        zb = z.astype(_MXU_DTYPE)                          # cast once, reused twice
        hd = dense(zb, d1w_ref, d1b_ref, relu=True)
        recon = dense(hd, d2w_ref, d2b_ref, relu=False)    # (tb, in_dim) f32
        hp = dense(zb, p1w_ref, p1b_ref, relu=True)
        p = dense(hp, p2w_ref, p2b_ref, relu=False)        # (tb, proj_dim) f32
        return z, recon, p

    z1, recon1, p1 = forward_view(x1_ref[...])
    z2, recon2, p2 = forward_view(x2_ref[...])

    z1_ref[...] = z1
    z2_ref[...] = z2
    r1_ref[...] = recon1
    r2_ref[...] = recon2

    # --- single-pass BN / cross-correlation statistics (all f32) ---
    # Gram in f32 operands: only ~small fraction of total FLOPs, avoids the
    # bf16 cancellation issue flagged in review.
    gram_ref[...] += lax.dot_general(
        p1, p2, dimension_numbers=(((0,), (0,)), ((), ())),
        preferred_element_type=jnp.float32)

    ones_col = jnp.ones((p1.shape[0], 1), jnp.float32)
    # View-1 stats as COLUMN vectors (so the final row-broadcast needs no transpose).
    s1_ref[...] += lax.dot_general(
        p1, ones_col, dimension_numbers=(((0,), (0,)), ((), ())),
        preferred_element_type=jnp.float32)
    q1_ref[...] += lax.dot_general(
        p1 * p1, ones_col, dimension_numbers=(((0,), (0,)), ((), ())),
        preferred_element_type=jnp.float32)
    # View-2 stats as ROW vectors (plain sublane reductions).
    s2_ref[...] += jnp.sum(p2, axis=0, keepdims=True)
    q2_ref[...] += jnp.sum(p2 * p2, axis=0, keepdims=True)

    @pl.when(step == last)
    def _finalize():
        inv_n = jnp.float32(1.0 / n_total)
        m1 = s1_ref[...] * inv_n                      # (D, 1)
        m2 = s2_ref[...] * inv_n                      # (1, D)
        v1 = q1_ref[...] * inv_n - m1 * m1            # (D, 1) biased variance
        v2 = q2_ref[...] * inv_n - m2 * m2            # (1, D)
        r1s = lax.rsqrt(v1 + jnp.float32(eps))
        r2s = lax.rsqrt(v2 + jnp.float32(eps))

        # c = bn(p1)^T @ bn(p2) / n  (algebraic form; (D,1)*(1,D) broadcasts).
        c = (gram_ref[...] * inv_n - m1 * m2) * (r1s * r2s)

        d = c.shape[0]
        row = lax.broadcasted_iota(jnp.int32, (d, d), 0)
        col = lax.broadcasted_iota(jnp.int32, (d, d), 1)
        eye = row == col
        on_diag = jnp.sum(jnp.where(eye, (c - 1.0) ** 2, 0.0))
        off_diag = jnp.sum(jnp.where(eye, 0.0, c * c))   # masked (no cancellation)

        loss_ref[0, 0] = jnp.float32(scale_factor) * (
            on_diag + jnp.float32(lambd) * off_diag)


# ----------------------------------------------------------------------------
# Parameter init (torch.nn.Linear-like) + one-time packing (pad + bf16 at rest)
# ----------------------------------------------------------------------------
def init_linear(key, in_dim, out_dim):
    kw, kb = jax.random.split(key)
    bound = 1.0 / jnp.sqrt(jnp.float32(in_dim))
    w = jax.random.uniform(kw, (in_dim, out_dim), jnp.float32, -bound, bound)
    b = jax.random.uniform(kb, (1, out_dim), jnp.float32, -bound, bound)
    return w, b


def init_params(key, input_size, latent_dim, hidden, proj_dim):
    keys = jax.random.split(key, 6)
    return {
        "enc1": init_linear(keys[0], input_size, hidden),
        "enc2": init_linear(keys[1], hidden, latent_dim),
        "dec1": init_linear(keys[2], latent_dim, hidden),
        "dec2": init_linear(keys[3], hidden, input_size),
        "proj1": init_linear(keys[4], latent_dim, hidden),
        "proj2": init_linear(keys[5], hidden, proj_dim),
    }


def pack_params(params, latent_dim):
    """One-time prep: lane-pad latent dim to 128, store weights bf16 at rest."""
    lp = max(_round_up(latent_dim, _LANE), _LANE)
    pad = lp - latent_dim

    e1w, e1b = params["enc1"]
    e2w, e2b = params["enc2"]
    d1w, d1b = params["dec1"]
    d2w, d2b = params["dec2"]
    p1w, p1b = params["proj1"]
    p2w, p2b = params["proj2"]

    e2w = jnp.pad(e2w, ((0, 0), (0, pad)))   # pad output features (zero cols)
    e2b = jnp.pad(e2b, ((0, 0), (0, pad)))
    d1w = jnp.pad(d1w, ((0, pad), (0, 0)))   # pad input features (zero rows)
    p1w = jnp.pad(p1w, ((0, pad), (0, 0)))

    bf = lambda w: w.astype(_MXU_DTYPE)
    return {
        "e1w": bf(e1w), "e1b": e1b, "e2w": bf(e2w), "e2b": e2b,
        "d1w": bf(d1w), "d1b": d1b, "d2w": bf(d2w), "d2b": d2b,
        "p1w": bf(p1w), "p1b": p1b, "p2w": bf(p2w), "p2b": p2b,
        "latent_dim": latent_dim, "latent_pad": lp,
    }


# ----------------------------------------------------------------------------
# scBarlowTwins forward (single batch-tiled pallas_call)
# ----------------------------------------------------------------------------
def sc_barlow_twins_forward(packed, x1, x2, lambd=0.0039, scale_factor=1.0,
                            eps=1e-5, batch_tile=128):
    # batch_tile: 128-aligned is enough for v5e (4x128^2 MXU); use 256 on v6e/v7x.
    n, in_dim = x1.shape
    assert x2.shape == (n, in_dim)
    latent = packed["latent_dim"]
    lp = packed["latent_pad"]
    proj_dim = packed["p2w"].shape[1]

    tb = _pick_batch_tile(n, batch_tile)
    num_tiles = n // tb

    weight_names = ("e1w", "e1b", "e2w", "e2b", "d1w", "d1b",
                    "d2w", "d2b", "p1w", "p1b", "p2w", "p2b")
    weight_args = [packed[k] for k in weight_names]

    # Weights: whole-array blocks with a constant index_map -> DMA'd once,
    # VMEM-resident across every grid step.
    def resident(arr):
        return pl.BlockSpec(arr.shape, lambda i: (0, 0))

    x_spec = pl.BlockSpec((tb, in_dim), lambda i: (i, 0))

    kernel = functools.partial(
        _fused_kernel,
        n_total=n, lambd=lambd, scale_factor=scale_factor, eps=eps,
    )

    z1, z2, recon1, recon2, loss = pl.pallas_call(
        kernel,
        grid=(num_tiles,),
        out_shape=(
            jax.ShapeDtypeStruct((n, lp), jnp.float32),
            jax.ShapeDtypeStruct((n, lp), jnp.float32),
            jax.ShapeDtypeStruct((n, in_dim), jnp.float32),
            jax.ShapeDtypeStruct((n, in_dim), jnp.float32),
            jax.ShapeDtypeStruct((1, 1), jnp.float32),
        ),
        in_specs=[x_spec, x_spec] + [resident(a) for a in weight_args],
        out_specs=(
            pl.BlockSpec((tb, lp), lambda i: (i, 0)),
            pl.BlockSpec((tb, lp), lambda i: (i, 0)),
            pl.BlockSpec((tb, in_dim), lambda i: (i, 0)),
            pl.BlockSpec((tb, in_dim), lambda i: (i, 0)),
            pl.BlockSpec((1, 1), lambda i: (0, 0),
                         memory_space=pltpu.MemorySpace.SMEM),
        ),
        scratch_shapes=[
            pltpu.VMEM((proj_dim, proj_dim), jnp.float32),   # Gram accumulator
            pltpu.VMEM((proj_dim, 1), jnp.float32),          # sum(p1)      (col)
            pltpu.VMEM((proj_dim, 1), jnp.float32),          # sum(p1^2)    (col)
            pltpu.VMEM((1, proj_dim), jnp.float32),          # sum(p2)      (row)
            pltpu.VMEM((1, proj_dim), jnp.float32),          # sum(p2^2)    (row)
        ],
        compiler_params=pltpu.CompilerParams(
            # Batch-tile axis carries the accumulators -> reduction ("arbitrary").
            dimension_semantics=("arbitrary",),
            # Keep within v7x's 64 MiB VMEM with headroom for double buffers.
            vmem_limit_bytes=40 * 1024 * 1024,
        ),
    )(x1, x2, *weight_args)

    return z1[:, :latent], z2[:, :latent], recon1, recon2, loss[0, 0]


# ----------------------------------------------------------------------------
# Pure-JAX reference (same bf16 matmul numerics) for a sanity check
# ----------------------------------------------------------------------------
def _reference_forward(packed, x1, x2, lambd=0.0039, scale_factor=1.0, eps=1e-5):
    latent = packed["latent_dim"]

    def mm(a, w):
        return lax.dot_general(a.astype(_MXU_DTYPE), w,
                               dimension_numbers=(((1,), (0,)), ((), ())),
                               preferred_element_type=jnp.float32)

    def fwd(x):
        h = jnp.maximum(mm(x, packed["e1w"]) + packed["e1b"], 0.0)
        z = mm(h, packed["e2w"]) + packed["e2b"]
        hd = jnp.maximum(mm(z, packed["d1w"]) + packed["d1b"], 0.0)
        recon = mm(hd, packed["d2w"]) + packed["d2b"]
        hp = jnp.maximum(mm(z, packed["p1w"]) + packed["p1b"], 0.0)
        p = mm(hp, packed["p2w"]) + packed["p2b"]
        return z[:, :latent], recon, p

    z1, r1, p1 = fwd(x1)
    z2, r2, p2 = fwd(x2)

    def bn(v):
        m = jnp.mean(v, axis=0, keepdims=True)
        var = jnp.mean((v - m) ** 2, axis=0, keepdims=True)
        return (v - m) * lax.rsqrt(var + jnp.float32(eps))

    n = x1.shape[0]
    c = jnp.dot(bn(p1).T, bn(p2), precision=lax.Precision.HIGHEST) / n
    diag = jnp.diag(c)
    on_diag = jnp.sum((diag - 1.0) ** 2)
    d = c.shape[0]
    eye = jnp.eye(d, dtype=bool)
    off_diag = jnp.sum(jnp.where(eye, 0.0, c * c))
    loss = scale_factor * (on_diag + lambd * off_diag)
    return z1, z2, r1, r2, loss


if __name__ == "__main__":
    # Small shapes consistent with the module (input -> latent -> proj/BN dim).
    batch = 8
    input_size = 64     # stands in for 1723
    latent_dim = 16     # stands in for 50
    hidden = 32
    proj_dim = 128      # stands in for 1024 (BatchNorm1d feature dim)

    key = jax.random.PRNGKey(0)
    kp, k1, k2 = jax.random.split(key, 3)
    params = init_params(kp, input_size, latent_dim, hidden, proj_dim)
    packed = pack_params(params, latent_dim)
    x1 = jax.random.normal(k1, (batch, input_size), jnp.float32)
    x2 = jax.random.normal(k2, (batch, input_size), jnp.float32)

    z1, z2, recon1, recon2, loss = sc_barlow_twins_forward(packed, x1, x2)
    jax.block_until_ready((z1, z2, recon1, recon2, loss))

    assert z1.shape == (batch, latent_dim)
    assert z2.shape == (batch, latent_dim)
    assert recon1.shape == (batch, input_size)
    assert recon2.shape == (batch, input_size)
    assert loss.shape == ()
    assert bool(jnp.isfinite(loss))

    # Numerical sanity check against a pure-JAX reference with matching numerics.
    z1r, z2r, r1r, r2r, loss_r = _reference_forward(packed, x1, x2)
    assert jnp.allclose(z1, z1r, atol=5e-3, rtol=5e-3)
    assert jnp.allclose(z2, z2r, atol=5e-3, rtol=5e-3)
    assert jnp.allclose(recon1, r1r, atol=5e-3, rtol=5e-3)
    assert jnp.allclose(recon2, r2r, atol=5e-3, rtol=5e-3)
    assert abs(float(loss) - float(loss_r)) <= 5e-2 * abs(float(loss_r)) + 1e-3

    print("KERNEL_OK")
</pallas_src>

<mosaic_0001>
module attributes {stable_mosaic.version = 11 : i64} {
  func.func @_fused_kernel(%arg0: i32, %arg1: memref<8x64xf32, #tpu.memory_space<vmem>>, %arg2: memref<8x64xf32, #tpu.memory_space<vmem>>, %arg3: memref<64x32xbf16, #tpu.memory_space<vmem>>, %arg4: memref<1x32xf32, #tpu.memory_space<vmem>>, %arg5: memref<32x128xbf16, #tpu.memory_space<vmem>>, %arg6: memref<1x128xf32, #tpu.memory_space<vmem>>, %arg7: memref<128x32xbf16, #tpu.memory_space<vmem>>, %arg8: memref<1x32xf32, #tpu.memory_space<vmem>>, %arg9: memref<32x64xbf16, #tpu.memory_space<vmem>>, %arg10: memref<1x64xf32, #tpu.memory_space<vmem>>, %arg11: memref<128x32xbf16, #tpu.memory_space<vmem>>, %arg12: memref<1x32xf32, #tpu.memory_space<vmem>>, %arg13: memref<32x128xbf16, #tpu.memory_space<vmem>>, %arg14: memref<1x128xf32, #tpu.memory_space<vmem>>, %arg15: memref<8x128xf32, #tpu.memory_space<vmem>>, %arg16: memref<8x128xf32, #tpu.memory_space<vmem>>, %arg17: memref<8x64xf32, #tpu.memory_space<vmem>>, %arg18: memref<8x64xf32, #tpu.memory_space<vmem>>, %arg19: memref<1x1xf32, #tpu.memory_space<smem>>, %arg20: memref<128x128xf32, #tpu.memory_space<vmem>>, %arg21: memref<128x1xf32, #tpu.memory_space<vmem>>, %arg22: memref<128x1xf32, #tpu.memory_space<vmem>>, %arg23: memref<1x128xf32, #tpu.memory_space<vmem>>, %arg24: memref<1x128xf32, #tpu.memory_space<vmem>>) attributes {dimension_semantics = [#tpu.dimension_semantics<arbitrary>], iteration_bounds = array<i64: 1>, scalar_prefetch = 0 : i64, scratch_operands = 5 : i64, tpu.core_type = #tpu.core_type<tc>, window_params = [{transform_indices = @transform_0, window_bounds = array<i64: 8, 64>}, {transform_indices = @transform_1, window_bounds = array<i64: 8, 64>}, {pipeline_mode = #tpu.pipeline_mode<synchronous>, transform_indices = @transform_2, window_bounds = array<i64: 64, 32>}, {pipeline_mode = #tpu.pipeline_mode<synchronous>, transform_indices = @transform_3, window_bounds = array<i64: 1, 32>}, {pipeline_mode = #tpu.pipeline_mode<synchronous>, transform_indices = @transform_4, window_bounds = array<i64: 32, 128>}, {pipeline_mode = #tpu.pipeline_mode<synchronous>, transform_indices = @transform_5, window_bounds = array<i64: 1, 128>}, {pipeline_mode = #tpu.pipeline_mode<synchronous>, transform_indices = @transform_6, window_bounds = array<i64: 128, 32>}, {pipeline_mode = #tpu.pipeline_mode<synchronous>, transform_indices = @transform_7, window_bounds = array<i64: 1, 32>}, {pipeline_mode = #tpu.pipeline_mode<synchronous>, transform_indices = @transform_8, window_bounds = array<i64: 32, 64>}, {pipeline_mode = #tpu.pipeline_mode<synchronous>, transform_indices = @transform_9, window_bounds = array<i64: 1, 64>}, {pipeline_mode = #tpu.pipeline_mode<synchronous>, transform_indices = @transform_10, window_bounds = array<i64: 128, 32>}, {pipeline_mode = #tpu.pipeline_mode<synchronous>, transform_indices = @transform_11, window_bounds = array<i64: 1, 32>}, {pipeline_mode = #tpu.pipeline_mode<synchronous>, transform_indices = @transform_12, window_bounds = array<i64: 32, 128>}, {pipeline_mode = #tpu.pipeline_mode<synchronous>, transform_indices = @transform_13, window_bounds = array<i64: 1, 128>}, {transform_indices = @transform_14, window_bounds = array<i64: 8, 128>}, {transform_indices = @transform_15, window_bounds = array<i64: 8, 128>}, {transform_indices = @transform_16, window_bounds = array<i64: 8, 64>}, {transform_indices = @transform_17, window_bounds = array<i64: 8, 64>}, {transform_indices = @transform_18, window_bounds = array<i64: 1, 1>}]} {
    %c0_i32 = arith.constant 0 : i32
    %0 = arith.cmpi eq, %arg0, %c0_i32 : i32
    %1 = arith.extui %0 : i1 to i32
    %c0_i32_0 = arith.constant 0 : i32
    %2 = arith.cmpi ne, %1, %c0_i32_0 : i32
    scf.if %2 {
      %cst_105 = arith.constant 0.000000e+00 : f32
      %119 = vector.broadcast %cst_105 : f32 to vector<128x128xf32>
      %c0_106 = arith.constant 0 : index
      %c0_107 = arith.constant 0 : index
      %120 = vector.load %arg20[%c0_106, %c0_107] : memref<128x128xf32, #tpu.memory_space<vmem>>, vector<128x128xf32>
      tpu.vector_store %arg20[%c0_106, %c0_107], %119 {strides = array<i32>} : memref<128x128xf32, #tpu.memory_space<vmem>>, vector<128x128xf32>,
      %cst_108 = arith.constant 0.000000e+00 : f32
      %121 = vector.broadcast %cst_108 : f32 to vector<128x1xf32>
      %c0_109 = arith.constant 0 : index
      %c0_110 = arith.constant 0 : index
      %122 = vector.load %arg21[%c0_109, %c0_110] : memref<128x1xf32, #tpu.memory_space<vmem>>, vector<128x1xf32>
      tpu.vector_store %arg21[%c0_109, %c0_110], %121 {strides = array<i32>} : memref<128x1xf32, #tpu.memory_space<vmem>>, vector<128x1xf32>,
      %cst_111 = arith.constant 0.000000e+00 : f32
      %123 = vector.broadcast %cst_111 : f32 to vector<128x1xf32>
      %c0_112 = arith.constant 0 : index
      %c0_113 = arith.constant 0 : index
      %124 = vector.load %arg22[%c0_112, %c0_113] : memref<128x1xf32, #tpu.memory_space<vmem>>, vector<128x1xf32>
      tpu.vector_store %arg22[%c0_112, %c0_113], %123 {strides = array<i32>} : memref<128x1xf32, #tpu.memory_space<vmem>>, vector<128x1xf32>,
      %cst_114 = arith.constant 0.000000e+00 : f32
      %125 = vector.broadcast %cst_114 : f32 to vector<1x128xf32>
      %c0_115 = arith.constant 0 : index
      %c0_116 = arith.constant 0 : index
      %126 = vector.load %arg23[%c0_115, %c0_116] : memref<1x128xf32, #tpu.memory_space<vmem>>, vector<1x128xf32>
      tpu.vector_store %arg23[%c0_115, %c0_116], %125 {strides = array<i32>} : memref<1x128xf32, #tpu.memory_space<vmem>>, vector<1x128xf32>,
      %cst_117 = arith.constant 0.000000e+00 : f32
      %127 = vector.broadcast %cst_117 : f32 to vector<1x128xf32>
      %c0_118 = arith.constant 0 : index
      %c0_119 = arith.constant 0 : index
      %128 = vector.load %arg24[%c0_118, %c0_119] : memref<1x128xf32, #tpu.memory_space<vmem>>, vector<1x128xf32>
      tpu.vector_store %arg24[%c0_118, %c0_119], %127 {strides = array<i32>} : memref<1x128xf32, #tpu.memory_space<vmem>>, vector<1x128xf32>,
      %cst_120 = arith.constant 0.000000e+00 : f32
      %c0_121 = arith.constant 0 : index
      %c0_122 = arith.constant 0 : index
      %129 = memref.load %arg19[%c0_121, %c0_122] : memref<1x1xf32, #tpu.memory_space<smem>>
      memref.store %cst_120, %arg19[%c0_121, %c0_122] : memref<1x1xf32, #tpu.memory_space<smem>>
    } else {
    }
    %c0 = arith.constant 0 : index
    %c0_1 = arith.constant 0 : index
    %3 = vector.load %arg1[%c0, %c0_1] : memref<8x64xf32, #tpu.memory_space<vmem>>, vector<8x64xf32>
    %4 = arith.truncf %3 : vector<8x64xf32> to vector<8x64xbf16>
    %c0_2 = arith.constant 0 : index
    %c0_3 = arith.constant 0 : index
    %5 = vector.load %arg3[%c0_2, %c0_3] : memref<64x32xbf16, #tpu.memory_space<vmem>>, vector<64x32xbf16>
    %cst = arith.constant dense<0.000000e+00> : vector<8x32xf32>
    %6 = tpu.matmul %4, %5, %cst {dimension_numbers = #tpu.dot_dimension_numbers<[1], [0], [0], [1], [0, 0, 1, 1], [], []>} : vector<8x64xbf16>, vector<64x32xbf16>, vector<8x32xf32> -> vector<8x32xf32>
    %c0_4 = arith.constant 0 : index
    %c0_5 = arith.constant 0 : index
    %7 = vector.load %arg4[%c0_4, %c0_5] : memref<1x32xf32, #tpu.memory_space<vmem>>, vector<1x32xf32>
    %8 = vector.broadcast %7 : vector<1x32xf32> to vector<8x32xf32>
    %9 = arith.addf %6, %8 : vector<8x32xf32>
    %cst_6 = arith.constant 0.000000e+00 : f32
    %10 = vector.broadcast %cst_6 : f32 to vector<8x32xf32>
    %11 = arith.maximumf %9, %10 : vector<8x32xf32>
    %12 = arith.truncf %11 : vector<8x32xf32> to vector<8x32xbf16>
    %c0_7 = arith.constant 0 : index
    %c0_8 = arith.constant 0 : index
    %13 = vector.load %arg5[%c0_7, %c0_8] : memref<32x128xbf16, #tpu.memory_space<vmem>>, vector<32x128xbf16>
    %cst_9 = arith.constant dense<0.000000e+00> : vector<8x128xf32>
    %14 = tpu.matmul %12, %13, %cst_9 {dimension_numbers = #tpu.dot_dimension_numbers<[1], [0], [0], [1], [0, 0, 1, 1], [], []>} : vector<8x32xbf16>, vector<32x128xbf16>, vector<8x128xf32> -> vector<8x128xf32>
    %c0_10 = arith.constant 0 : index
    %c0_11 = arith.constant 0 : index
    %15 = vector.load %arg6[%c0_10, %c0_11] : memref<1x128xf32, #tpu.memory_space<vmem>>, vector<1x128xf32>
    %16 = vector.broadcast %15 : vector<1x128xf32> to vector<8x128xf32>
    %17 = arith.addf %14, %16 : vector<8x128xf32>
    %18 = arith.truncf %17 : vector<8x128xf32> to vector<8x128xbf16>
    %c0_12 = arith.constant 0 : index
    %c0_13 = arith.constant 0 : index
    %19 = vector.load %arg7[%c0_12, %c0_13] : memref<128x32xbf16, #tpu.memory_space<vmem>>, vector<128x32xbf16>
    %cst_14 = arith.constant dense<0.000000e+00> : vector<8x32xf32>
    %20 = tpu.matmul %18, %19, %cst_14 {dimension_numbers = #tpu.dot_dimension_numbers<[1], [0], [0], [1], [0, 0, 1, 1], [], []>} : vector<8x128xbf16>, vector<128x32xbf16>, vector<8x32xf32> -> vector<8x32xf32>
    %c0_15 = arith.constant 0 : index
    %c0_16 = arith.constant 0 : index
    %21 = vector.load %arg8[%c0_15, %c0_16] : memref<1x32xf32, #tpu.memory_space<vmem>>, vector<1x32xf32>
    %22 = vector.broadcast %21 : vector<1x32xf32> to vector<8x32xf32>
    %23 = arith.addf %20, %22 : vector<8x32xf32>
    %cst_17 = arith.constant 0.000000e+00 : f32
    %24 = vector.broadcast %cst_17 : f32 to vector<8x32xf32>
    %25 = arith.maximumf %23, %24 : vector<8x32xf32>
    %26 = arith.truncf %25 : vector<8x32xf32> to vector<8x32xbf16>
    %c0_18 = arith.constant 0 : index
    %c0_19 = arith.constant 0 : index
    %27 = vector.load %arg9[%c0_18, %c0_19] : memref<32x64xbf16, #tpu.memory_space<vmem>>, vector<32x64xbf16>
    %cst_20 = arith.constant dense<0.000000e+00> : vector<8x64xf32>
    %28 = tpu.matmul %26, %27, %cst_20 {dimension_numbers = #tpu.dot_dimension_numbers<[1], [0], [0], [1], [0, 0, 1, 1], [], []>} : vector<8x32xbf16>, vector<32x64xbf16>, vector<8x64xf32> -> vector<8x64xf32>
    %c0_21 = arith.constant 0 : index
    %c0_22 = arith.constant 0 : index
    %29 = vector.load %arg10[%c0_21, %c0_22] : memref<1x64xf32, #tpu.memory_space<vmem>>, vector<1x64xf32>
    %30 = vector.broadcast %29 : vector<1x64xf32> to vector<8x64xf32>
    %31 = arith.addf %28, %30 : vector<8x64xf32>
    %c0_23 = arith.constant 0 : index
    %c0_24 = arith.constant 0 : index
    %32 = vector.load %arg11[%c0_23, %c0_24] : memref<128x32xbf16, #tpu.memory_space<vmem>>, vector<128x32xbf16>
    %cst_25 = arith.constant dense<0.000000e+00> : vector<8x32xf32>
    %33 = tpu.matmul %18, %32, %cst_25 {dimension_numbers = #tpu.dot_dimension_numbers<[1], [0], [0], [1], [0, 0, 1, 1], [], []>} : vector<8x128xbf16>, vector<128x32xbf16>, vector<8x32xf32> -> vector<8x32xf32>
    %c0_26 = arith.constant 0 : index
    %c0_27 = arith.constant 0 : index
    %34 = vector.load %arg12[%c0_26, %c0_27] : memref<1x32xf32, #tpu.memory_space<vmem>>, vector<1x32xf32>
    %35 = vector.broadcast %34 : vector<1x32xf32> to vector<8x32xf32>
    %36 = arith.addf %33, %35 : vector<8x32xf32>
    %cst_28 = arith.constant 0.000000e+00 : f32
    %37 = vector.broadcast %cst_28 : f32 to vector<8x32xf32>
    %38 = arith.maximumf %36, %37 : vector<8x32xf32>
    %39 = arith.truncf %38 : vector<8x32xf32> to vector<8x32xbf16>
    %c0_29 = arith.constant 0 : index
    %c0_30 = arith.constant 0 : index
    %40 = vector.load %arg13[%c0_29, %c0_30] : memref<32x128xbf16, #tpu.memory_space<vmem>>, vector<32x128xbf16>
    %cst_31 = arith.constant dense<0.000000e+00> : vector<8x128xf32>
    %41 = tpu.matmul %39, %40, %cst_31 {dimension_numbers = #tpu.dot_dimension_numbers<[1], [0], [0], [1], [0, 0, 1, 1], [], []>} : vector<8x32xbf16>, vector<32x128xbf16>, vector<8x128xf32> -> vector<8x128xf32>
    %c0_32 = arith.constant 0 : index
    %c0_33 = arith.constant 0 : index
    %42 = vector.load %arg14[%c0_32, %c0_33] : memref<1x128xf32, #tpu.memory_space<vmem>>, vector<1x128xf32>
    %43 = vector.broadcast %42 : vector<1x128xf32> to vector<8x128xf32>
    %44 = arith.addf %41, %43 : vector<8x128xf32>
    %c0_34 = arith.constant 0 : index
    %c0_35 = arith.constant 0 : index
    %45 = vector.load %arg2[%c0_34, %c0_35] : memref<8x64xf32, #tpu.memory_space<vmem>>, vector<8x64xf32>
    %46 = arith.truncf %45 : vector<8x64xf32> to vector<8x64xbf16>
    %c0_36 = arith.constant 0 : index
    %c0_37 = arith.constant 0 : index
    %47 = vector.load %arg3[%c0_36, %c0_37] : memref<64x32xbf16, #tpu.memory_space<vmem>>, vector<64x32xbf16>
    %cst_38 = arith.constant dense<0.000000e+00> : vector<8x32xf32>
    %48 = tpu.matmul %46, %47, %cst_38 {dimension_numbers = #tpu.dot_dimension_numbers<[1], [0], [0], [1], [0, 0, 1, 1], [], []>} : vector<8x64xbf16>, vector<64x32xbf16>, vector<8x32xf32> -> vector<8x32xf32>
    %c0_39 = arith.constant 0 : index
    %c0_40 = arith.constant 0 : index
    %49 = vector.load %arg4[%c0_39, %c0_40] : memref<1x32xf32, #tpu.memory_space<vmem>>, vector<1x32xf32>
    %50 = vector.broadcast %49 : vector<1x32xf32> to vector<8x32xf32>
    %51 = arith.addf %48, %50 : vector<8x32xf32>
    %cst_41 = arith.constant 0.000000e+00 : f32
    %52 = vector.broadcast %cst_41 : f32 to vector<8x32xf32>
    %53 = arith.maximumf %51, %52 : vector<8x32xf32>
    %54 = arith.truncf %53 : vector<8x32xf32> to vector<8x32xbf16>
    %c0_42 = arith.constant 0 : index
    %c0_43 = arith.constant 0 : index
    %55 = vector.load %arg5[%c0_42, %c0_43] : memref<32x128xbf16, #tpu.memory_space<vmem>>, vector<32x128xbf16>
    %cst_44 = arith.constant dense<0.000000e+00> : vector<8x128xf32>
    %56 = tpu.matmul %54, %55, %cst_44 {dimension_numbers = #tpu.dot_dimension_numbers<[1], [0], [0], [1], [0, 0, 1, 1], [], []>} : vector<8x32xbf16>, vector<32x128xbf16>, vector<8x128xf32> -> vector<8x128xf32>
    %c0_45 = arith.constant 0 : index
    %c0_46 = arith.constant 0 : index
    %57 = vector.load %arg6[%c0_45, %c0_46] : memref<1x128xf32, #tpu.memory_space<vmem>>, vector<1x128xf32>
    %58 = vector.broadcast %57 : vector<1x128xf32> to vector<8x128xf32>
    %59 = arith.addf %56, %58 : vector<8x128xf32>
    %60 = arith.truncf %59 : vector<8x128xf32> to vector<8x128xbf16>
    %c0_47 = arith.constant 0 : index
    %c0_48 = arith.constant 0 : index
    %61 = vector.load %arg7[%c0_47, %c0_48] : memref<128x32xbf16, #tpu.memory_space<vmem>>, vector<128x32xbf16>
    %cst_49 = arith.constant dense<0.000000e+00> : vector<8x32xf32>
    %62 = tpu.matmul %60, %61, %cst_49 {dimension_numbers = #tpu.dot_dimension_numbers<[1], [0], [0], [1], [0, 0, 1, 1], [], []>} : vector<8x128xbf16>, vector<128x32xbf16>, vector<8x32xf32> -> vector<8x32xf32>
    %c0_50 = arith.constant 0 : index
    %c0_51 = arith.constant 0 : index
    %63 = vector.load %arg8[%c0_50, %c0_51] : memref<1x32xf32, #tpu.memory_space<vmem>>, vector<1x32xf32>
    %64 = vector.broadcast %63 : vector<1x32xf32> to vector<8x32xf32>
    %65 = arith.addf %62, %64 : vector<8x32xf32>
    %cst_52 = arith.constant 0.000000e+00 : f32
    %66 = vector.broadcast %cst_52 : f32 to vector<8x32xf32>
    %67 = arith.maximumf %65, %66 : vector<8x32xf32>
    %68 = arith.truncf %67 : vector<8x32xf32> to vector<8x32xbf16>
    %c0_53 = arith.constant 0 : index
    %c0_54 = arith.constant 0 : index
    %69 = vector.load %arg9[%c0_53, %c0_54] : memref<32x64xbf16, #tpu.memory_space<vmem>>, vector<32x64xbf16>
    %cst_55 = arith.constant dense<0.000000e+00> : vector<8x64xf32>
    %70 = tpu.matmul %68, %69, %cst_55 {dimension_numbers = #tpu.dot_dimension_numbers<[1], [0], [0], [1], [0, 0, 1, 1], [], []>} : vector<8x32xbf16>, vector<32x64xbf16>, vector<8x64xf32> -> vector<8x64xf32>
    %c0_56 = arith.constant 0 : index
    %c0_57 = arith.constant 0 : index
    %71 = vector.load %arg10[%c0_56, %c0_57] : memref<1x64xf32, #tpu.memory_space<vmem>>, vector<1x64xf32>
    %72 = vector.broadcast %71 : vector<1x64xf32> to vector<8x64xf32>
    %73 = arith.addf %70, %72 : vector<8x64xf32>
    %c0_58 = arith.constant 0 : index
    %c0_59 = arith.constant 0 : index
    %74 = vector.load %arg11[%c0_58, %c0_59] : memref<128x32xbf16, #tpu.memory_space<vmem>>, vector<128x32xbf16>
    %cst_60 = arith.constant dense<0.000000e+00> : vector<8x32xf32>
    %75 = tpu.matmul %60, %74, %cst_60 {dimension_numbers = #tpu.dot_dimension_numbers<[1], [0], [0], [1], [0, 0, 1, 1], [], []>} : vector<8x128xbf16>, vector<128x32xbf16>, vector<8x32xf32> -> vector<8x32xf32>
    %c0_61 = arith.constant 0 : index
    %c0_62 = arith.constant 0 : index
    %76 = vector.load %arg12[%c0_61, %c0_62] : memref<1x32xf32, #tpu.memory_space<vmem>>, vector<1x32xf32>
    %77 = vector.broadcast %76 : vector<1x32xf32> to vector<8x32xf32>
    %78 = arith.addf %75, %77 : vector<8x32xf32>
    %cst_63 = arith.constant 0.000000e+00 : f32
    %79 = vector.broadcast %cst_63 : f32 to vector<8x32xf32>
    %80 = arith.maximumf %78, %79 : vector<8x32xf32>
    %81 = arith.truncf %80 : vector<8x32xf32> to vector<8x32xbf16>
    %c0_64 = arith.constant 0 : index
    %c0_65 = arith.constant 0 : index
    %82 = vector.load %arg13[%c0_64, %c0_65] : memref<32x128xbf16, #tpu.memory_space<vmem>>, vector<32x128xbf16>
    %cst_66 = arith.constant dense<0.000000e+00> : vector<8x128xf32>
    %83 = tpu.matmul %81, %82, %cst_66 {dimension_numbers = #tpu.dot_dimension_numbers<[1], [0], [0], [1], [0, 0, 1, 1], [], []>} : vector<8x32xbf16>, vector<32x128xbf16>, vector<8x128xf32> -> vector<8x128xf32>
    %c0_67 = arith.constant 0 : index
    %c0_68 = arith.constant 0 : index
    %84 = vector.load %arg14[%c0_67, %c0_68] : memref<1x128xf32, #tpu.memory_space<vmem>>, vector<1x128xf32>
    %85 = vector.broadcast %84 : vector<1x128xf32> to vector<8x128xf32>
    %86 = arith.addf %83, %85 : vector<8x128xf32>
    %c0_69 = arith.constant 0 : index
    %c0_70 = arith.constant 0 : index
    %87 = vector.load %arg15[%c0_69, %c0_70] : memref<8x128xf32, #tpu.memory_space<vmem>>, vector<8x128xf32>
    tpu.vector_store %arg15[%c0_69, %c0_70], %17 {strides = array<i32>} : memref<8x128xf32, #tpu.memory_space<vmem>>, vector<8x128xf32>,
    %c0_71 = arith.constant 0 : index
    %c0_72 = arith.constant 0 : index
    %88 = vector.load %arg16[%c0_71, %c0_72] : memref<8x128xf32, #tpu.memory_space<vmem>>, vector<8x128xf32>
    tpu.vector_store %arg16[%c0_71, %c0_72], %59 {strides = array<i32>} : memref<8x128xf32, #tpu.memory_space<vmem>>, vector<8x128xf32>,
    %c0_73 = arith.constant 0 : index
    %c0_74 = arith.constant 0 : index
    %89 = vector.load %arg17[%c0_73, %c0_74] : memref<8x64xf32, #tpu.memory_space<vmem>>, vector<8x64xf32>
    tpu.vector_store %arg17[%c0_73, %c0_74], %31 {strides = array<i32>} : memref<8x64xf32, #tpu.memory_space<vmem>>, vector<8x64xf32>,
    %c0_75 = arith.constant 0 : index
    %c0_76 = arith.constant 0 : index
    %90 = vector.load %arg18[%c0_75, %c0_76] : memref<8x64xf32, #tpu.memory_space<vmem>>, vector<8x64xf32>
    tpu.vector_store %arg18[%c0_75, %c0_76], %73 {strides = array<i32>} : memref<8x64xf32, #tpu.memory_space<vmem>>, vector<8x64xf32>,
    %c0_77 = arith.constant 0 : index
    %c0_78 = arith.constant 0 : index
    %91 = vector.load %arg20[%c0_77, %c0_78] : memref<128x128xf32, #tpu.memory_space<vmem>>, vector<128x128xf32>
    %cst_79 = arith.constant dense<0.000000e+00> : vector<128x128xf32>
    %92 = tpu.matmul %44, %86, %cst_79 {dimension_numbers = #tpu.dot_dimension_numbers<[0], [0], [1], [1], [0, 1, 1, 1], [], []>} : vector<8x128xf32>, vector<8x128xf32>, vector<128x128xf32> -> vector<128x128xf32>
    %93 = arith.addf %91, %92 : vector<128x128xf32>
    %c0_80 = arith.constant 0 : index
    %c0_81 = arith.constant 0 : index
    %94 = vector.load %arg20[%c0_80, %c0_81] : memref<128x128xf32, #tpu.memory_space<vmem>>, vector<128x128xf32>
    tpu.vector_store %arg20[%c0_80, %c0_81], %93 {strides = array<i32>} : memref<128x128xf32, #tpu.memory_space<vmem>>, vector<128x128xf32>,
    %cst_82 = arith.constant 1.000000e+00 : f32
    %95 = vector.broadcast %cst_82 : f32 to vector<8x1xf32>
    %c0_83 = arith.constant 0 : index
    %c0_84 = arith.constant 0 : index
    %96 = vector.load %arg21[%c0_83, %c0_84] : memref<128x1xf32, #tpu.memory_space<vmem>>, vector<128x1xf32>
    %cst_85 = arith.constant dense<0.000000e+00> : vector<128x1xf32>
    %97 = tpu.matmul %44, %95, %cst_85 {dimension_numbers = #tpu.dot_dimension_numbers<[0], [0], [1], [1], [0, 1, 1, 1], [], []>} : vector<8x128xf32>, vector<8x1xf32>, vector<128x1xf32> -> vector<128x1xf32>
    %98 = arith.addf %96, %97 : vector<128x1xf32>
    %c0_86 = arith.constant 0 : index
    %c0_87 = arith.constant 0 : index
    %99 = vector.load %arg21[%c0_86, %c0_87] : memref<128x1xf32, #tpu.memory_space<vmem>>, vector<128x1xf32>
    tpu.vector_store %arg21[%c0_86, %c0_87], %98 {strides = array<i32>} : memref<128x1xf32, #tpu.memory_space<vmem>>, vector<128x1xf32>,
    %c0_88 = arith.constant 0 : index
    %c0_89 = arith.constant 0 : index
    %100 = vector.load %arg22[%c0_88, %c0_89] : memref<128x1xf32, #tpu.memory_space<vmem>>, vector<128x1xf32>
    %101 = arith.mulf %44, %44 : vector<8x128xf32>
    %cst_90 = arith.constant dense<0.000000e+00> : vector<128x1xf32>
    %102 = tpu.matmul %101, %95, %cst_90 {dimension_numbers = #tpu.dot_dimension_numbers<[0], [0], [1], [1], [0, 1, 1, 1], [], []>} : vector<8x128xf32>, vector<8x1xf32>, vector<128x1xf32> -> vector<128x1xf32>
    %103 = arith.addf %100, %102 : vector<128x1xf32>
    %c0_91 = arith.constant 0 : index
    %c0_92 = arith.constant 0 : index
    %104 = vector.load %arg22[%c0_91, %c0_92] : memref<128x1xf32, #tpu.memory_space<vmem>>, vector<128x1xf32>
    tpu.vector_store %arg22[%c0_91, %c0_92], %103 {strides = array<i32>} : memref<128x1xf32, #tpu.memory_space<vmem>>, vector<128x1xf32>,
    %c0_93 = arith.constant 0 : index
    %c0_94 = arith.constant 0 : index
    %105 = vector.load %arg23[%c0_93, %c0_94] : memref<1x128xf32, #tpu.memory_space<vmem>>, vector<1x128xf32>
    %cst_95 = arith.constant dense<0.000000e+00> : vector<128xf32>
    %106 = vector.multi_reduction <add>, %86, %cst_95 [0] : vector<8x128xf32> to vector<128xf32>
    %107 = vector.shape_cast %106 : vector<128xf32> to vector<1x128xf32>
    %108 = arith.addf %105, %107 : vector<1x128xf32>
    %c0_96 = arith.constant 0 : index
    %c0_97 = arith.constant 0 : index
    %109 = vector.load %arg23[%c0_96, %c0_97] : memref<1x128xf32, #tpu.memory_space<vmem>>, vector<1x128xf32>
    tpu.vector_store %arg23[%c0_96, %c0_97], %108 {strides = array<i32>} : memref<1x128xf32, #tpu.memory_space<vmem>>, vector<1x128xf32>,
    %c0_98 = arith.constant 0 : index
    %c0_99 = arith.constant 0 : index
    %110 = vector.load %arg24[%c0_98, %c0_99] : memref<1x128xf32, #tpu.memory_space<vmem>>, vector<1x128xf32>
    %111 = arith.mulf %86, %86 : vector<8x128xf32>
    %cst_100 = arith.constant dense<0.000000e+00> : vector<128xf32>
    %112 = vector.multi_reduction <add>, %111, %cst_100 [0] : vector<8x128xf32> to vector<128xf32>
    %113 = vector.shape_cast %112 : vector<128xf32> to vector<1x128xf32>
    %114 = arith.addf %110, %113 : vector<1x128xf32>
    %c0_101 = arith.constant 0 : index
    %c0_102 = arith.constant 0 : index
    %115 = vector.load %arg24[%c0_101, %c0_102] : memref<1x128xf32, #tpu.memory_space<vmem>>, vector<1x128xf32>
    tpu.vector_store %arg24[%c0_101, %c0_102], %114 {strides = array<i32>} : memref<1x128xf32, #tpu.memory_space<vmem>>, vector<1x128xf32>,
    %c0_i32_103 = arith.constant 0 : i32
    %116 = arith.cmpi eq, %arg0, %c0_i32_103 : i32
    %117 = arith.extui %116 : i1 to i32
    %c0_i32_104 = arith.constant 0 : i32
    %118 = arith.cmpi ne, %117, %c0_i32_104 : i32
    scf.if %118 {
      %c0_105 = arith.constant 0 : index
      %c0_106 = arith.constant 0 : index
      %119 = vector.load %arg21[%c0_105, %c0_106] : memref<128x1xf32, #tpu.memory_space<vmem>>, vector<128x1xf32>
      %cst_107 = arith.constant 1.250000e-01 : f32
      %120 = vector.broadcast %cst_107 : f32 to vector<128x1xf32>
      %121 = arith.mulf %119, %120 : vector<128x1xf32>
      %c0_108 = arith.constant 0 : index
      %c0_109 = arith.constant 0 : index
      %122 = vector.load %arg23[%c0_108, %c0_109] : memref<1x128xf32, #tpu.memory_space<vmem>>, vector<1x128xf32>
      %cst_110 = arith.constant 1.250000e-01 : f32
      %123 = vector.broadcast %cst_110 : f32 to vector<1x128xf32>
      %124 = arith.mulf %122, %123 : vector<1x128xf32>
      %c0_111 = arith.constant 0 : index
      %c0_112 = arith.constant 0 : index
      %125 = vector.load %arg22[%c0_111, %c0_112] : memref<128x1xf32, #tpu.memory_space<vmem>>, vector<128x1xf32>
      %cst_113 = arith.constant 1.250000e-01 : f32
      %126 = vector.broadcast %cst_113 : f32 to vector<128x1xf32>
      %127 = arith.mulf %125, %126 : vector<128x1xf32>
      %128 = arith.mulf %121, %121 : vector<128x1xf32>
      %129 = arith.subf %127, %128 : vector<128x1xf32>
      %c0_114 = arith.constant 0 : index
      %c0_115 = arith.constant 0 : index
      %130 = vector.load %arg24[%c0_114, %c0_115] : memref<1x128xf32, #tpu.memory_space<vmem>>, vector<1x128xf32>
      %cst_116 = arith.constant 1.250000e-01 : f32
      %131 = vector.broadcast %cst_116 : f32 to vector<1x128xf32>
      %132 = arith.mulf %130, %131 : vector<1x128xf32>
      %133 = arith.mulf %124, %124 : vector<1x128xf32>
      %134 = arith.subf %132, %133 : vector<1x128xf32>
      %cst_117 = arith.constant 9.99999974E-6 : f32
      %135 = vector.broadcast %cst_117 : f32 to vector<128x1xf32>
      %136 = arith.addf %129, %135 : vector<128x1xf32>
      %137 = math.rsqrt %136 : vector<128x1xf32>
      %cst_118 = arith.constant 9.99999974E-6 : f32
      %138 = vector.broadcast %cst_118 : f32 to vector<1x128xf32>
      %139 = arith.addf %134, %138 : vector<1x128xf32>
      %140 = math.rsqrt %139 : vector<1x128xf32>
      %c0_119 = arith.constant 0 : index
      %c0_120 = arith.constant 0 : index
      %141 = vector.load %arg20[%c0_119, %c0_120] : memref<128x128xf32, #tpu.memory_space<vmem>>, vector<128x128xf32>
      %cst_121 = arith.constant 1.250000e-01 : f32
      %142 = vector.broadcast %cst_121 : f32 to vector<128x128xf32>
      %143 = arith.mulf %141, %142 : vector<128x128xf32>
      %144 = vector.broadcast %121 : vector<128x1xf32> to vector<128x128xf32>
      %145 = vector.broadcast %124 : vector<1x128xf32> to vector<128x128xf32>
      %146 = arith.mulf %144, %145 : vector<128x128xf32>
      %147 = arith.subf %143, %146 : vector<128x128xf32>
      %148 = vector.broadcast %137 : vector<128x1xf32> to vector<128x128xf32>
      %149 = vector.broadcast %140 : vector<1x128xf32> to vector<128x128xf32>
      %150 = arith.mulf %148, %149 : vector<128x128xf32>
      %151 = arith.mulf %147, %150 : vector<128x128xf32>
      %152 = tpu.iota {dimensions = array<i32: 0>} : vector<128x128xi32>
      %153 = tpu.iota {dimensions = array<i32: 1>} : vector<128x128xi32>
      %154 = arith.cmpi eq, %152, %153 : vector<128x128xi32>
      %cst_122 = arith.constant 1.000000e+00 : f32
      %155 = vector.broadcast %cst_122 : f32 to vector<128x128xf32>
      %156 = arith.subf %151, %155 : vector<128x128xf32>
      %157 = arith.mulf %156, %156 : vector<128x128xf32>
      %cst_123 = arith.constant 0.000000e+00 : f32
      %158 = vector.broadcast %cst_123 : f32 to vector<128x128xf32>
      %159 = arith.select %154, %157, %158 : vector<128x128xi1>, vector<128x128xf32>
      %160 = vector.shape_cast %159 : vector<128x128xf32> to vector<1x128x128xf32>
      %cst_124 = arith.constant dense<0.000000e+00> : vector<1xf32>
      %161 = vector.multi_reduction <add>, %160, %cst_124 [1, 2] : vector<1x128x128xf32> to vector<1xf32>
      %162 = vector.shape_cast %161 : vector<1xf32> to vector<1x1x1xf32>
      %163 = vector.extract %162[0, 0, 0] : f32 from vector<1x1x1xf32>
      %164 = arith.mulf %151, %151 : vector<128x128xf32>
      %cst_125 = arith.constant 0.000000e+00 : f32
      %165 = vector.broadcast %cst_125 : f32 to vector<128x128xf32>
      %166 = arith.select %154, %165, %164 : vector<128x128xi1>, vector<128x128xf32>
      %167 = vector.shape_cast %166 : vector<128x128xf32> to vector<1x128x128xf32>
      %cst_126 = arith.constant dense<0.000000e+00> : vector<1xf32>
      %168 = vector.multi_reduction <add>, %167, %cst_126 [1, 2] : vector<1x128x128xf32> to vector<1xf32>
      %169 = vector.shape_cast %168 : vector<1xf32> to vector<1x1x1xf32>
      %170 = vector.extract %169[0, 0, 0] : f32 from vector<1x1x1xf32>
      %cst_127 = arith.constant 3.900000e-03 : f32
      %171 = arith.mulf %cst_127, %170 : f32
      %172 = arith.addf %163, %171 : f32
      %cst_128 = arith.constant 1.000000e+00 : f32
      %173 = arith.mulf %cst_128, %172 : f32
      %c0_129 = arith.constant 0 : index
      %c0_130 = arith.constant 0 : index
      %174 = memref.load %arg19[%c0_129, %c0_130] : memref<1x1xf32, #tpu.memory_space<smem>>
      memref.store %173, %arg19[%c0_129, %c0_130] : memref<1x1xf32, #tpu.memory_space<smem>>
    } else {
    }
    return
  }
  func.func @transform_0(%arg0: i32) -> (i32, i32) {
    %c0_i32 = arith.constant 0 : i32
    %c0_i32_0 = arith.constant 0 : i32
    return %arg0, %c0_i32 : i32, i32
  }
  func.func @transform_1(%arg0: i32) -> (i32, i32) {
    %c0_i32 = arith.constant 0 : i32
    %c0_i32_0 = arith.constant 0 : i32
    return %arg0, %c0_i32 : i32, i32
  }
  func.func @transform_2(%arg0: i32) -> (i32, i32) {
    %c0_i32 = arith.constant 0 : i32
    %c0_i32_0 = arith.constant 0 : i32
    %c0_i32_1 = arith.constant 0 : i32
    return %c0_i32, %c0_i32_0 : i32, i32
  }
  func.func @transform_3(%arg0: i32) -> (i32, i32) {
    %c0_i32 = arith.constant 0 : i32
    %c0_i32_0 = arith.constant 0 : i32
    %c0_i32_1 = arith.constant 0 : i32
    return %c0_i32, %c0_i32_0 : i32, i32
  }
  func.func @transform_4(%arg0: i32) -> (i32, i32) {
    %c0_i32 = arith.constant 0 : i32
    %c0_i32_0 = arith.constant 0 : i32
    %c0_i32_1 = arith.constant 0 : i32
    return %c0_i32, %c0_i32_0 : i32, i32
  }
  func.func @transform_5(%arg0: i32) -> (i32, i32) {
    %c0_i32 = arith.constant 0 : i32
    %c0_i32_0 = arith.constant 0 : i32
    %c0_i32_1 = arith.constant 0 : i32
    return %c0_i32, %c0_i32_0 : i32, i32
  }
  func.func @transform_6(%arg0: i32) -> (i32, i32) {
    %c0_i32 = arith.constant 0 : i32
    %c0_i32_0 = arith.constant 0 : i32
    %c0_i32_1 = arith.constant 0 : i32
    return %c0_i32, %c0_i32_0 : i32, i32
  }
  func.func @transform_7(%arg0: i32) -> (i32, i32) {
    %c0_i32 = arith.constant 0 : i32
    %c0_i32_0 = arith.constant 0 : i32
    %c0_i32_1 = arith.constant 0 : i32
    return %c0_i32, %c0_i32_0 : i32, i32
  }
  func.func @transform_8(%arg0: i32) -> (i32, i32) {
    %c0_i32 = arith.constant 0 : i32
    %c0_i32_0 = arith.constant 0 : i32
    %c0_i32_1 = arith.constant 0 : i32
    return %c0_i32, %c0_i32_0 : i32, i32
  }
  func.func @transform_9(%arg0: i32) -> (i32, i32) {
    %c0_i32 = arith.constant 0 : i32
    %c0_i32_0 = arith.constant 0 : i32
    %c0_i32_1 = arith.constant 0 : i32
    return %c0_i32, %c0_i32_0 : i32, i32
  }
  func.func @transform_10(%arg0: i32) -> (i32, i32) {
    %c0_i32 = arith.constant 0 : i32
    %c0_i32_0 = arith.constant 0 : i32
    %c0_i32_1 = arith.constant 0 : i32
    return %c0_i32, %c0_i32_0 : i32, i32
  }
  func.func @transform_11(%arg0: i32) -> (i32, i32) {
    %c0_i32 = arith.constant 0 : i32
    %c0_i32_0 = arith.constant 0 : i32
    %c0_i32_1 = arith.constant 0 : i32
    return %c0_i32, %c0_i32_0 : i32, i32
  }
  func.func @transform_12(%arg0: i32) -> (i32, i32) {
    %c0_i32 = arith.constant 0 : i32
    %c0_i32_0 = arith.constant 0 : i32
    %c0_i32_1 = arith.constant 0 : i32
    return %c0_i32, %c0_i32_0 : i32, i32
  }
  func.func @transform_13(%arg0: i32) -> (i32, i32) {
    %c0_i32 = arith.constant 0 : i32
    %c0_i32_0 = arith.constant 0 : i32
    %c0_i32_1 = arith.constant 0 : i32
    return %c0_i32, %c0_i32_0 : i32, i32
  }
  func.func @transform_14(%arg0: i32) -> (i32, i32) {
    %c0_i32 = arith.constant 0 : i32
    %c0_i32_0 = arith.constant 0 : i32
    return %arg0, %c0_i32 : i32, i32
  }
  func.func @transform_15(%arg0: i32) -> (i32, i32) {
    %c0_i32 = arith.constant 0 : i32
    %c0_i32_0 = arith.constant 0 : i32
    return %arg0, %c0_i32 : i32, i32
  }
  func.func @transform_16(%arg0: i32) -> (i32, i32) {
    %c0_i32 = arith.constant 0 : i32
    %c0_i32_0 = arith.constant 0 : i32
    return %arg0, %c0_i32 : i32, i32
  }
  func.func @transform_17(%arg0: i32) -> (i32, i32) {
    %c0_i32 = arith.constant 0 : i32
    %c0_i32_0 = arith.constant 0 : i32
    return %arg0, %c0_i32 : i32, i32
  }
  func.func @transform_18(%arg0: i32) -> (i32, i32) {
    %c0_i32 = arith.constant 0 : i32
    %c0_i32_0 = arith.constant 0 : i32
    %c0_i32_1 = arith.constant 0 : i32
    return %c0_i32, %c0_i32_0 : i32, i32
  }
}

</mosaic_0001>

<bundles_post_ra>
// kernel: tpu_custom_call.1
= control target key start
LH: loop header
LB: loop body
LE: loop exit
PB: predicated region body
PF: predicated region fallthrough
CT: control target
= control target key end

     0   :  { %s3895_s0 = inlined_call_operand.vmem [shape: f32[8,64], index: 0, kind: input, shape index: {}]   ;;  %s3896_s1 = inlined_call_operand.vmem [shape: f32[8,64], index: 1, kind: input, shape index: {}]   ;;  %s3897_s2 = inlined_call_operand.vmem [shape: bf16[64,32], index: 2, kind: input, shape index: {}]   ;;  %s3898_s3 = inlined_call_operand.vmem [shape: f32[1,32], index: 3, kind: input, shape index: {}]   ;;  %s3899_s4 = inlined_call_operand.vmem [shape: bf16[32,128], index: 4, kind: input, shape index: {}]   ;;  %s3900_s5 = inlined_call_operand.vmem [shape: f32[1,128], index: 5, kind: input, shape index: {}]   ;;  %s3901_s6 = inlined_call_operand.vmem [shape: bf16[128,32], index: 6, kind: input, shape index: {}]   ;;  %s3902_s7 = inlined_call_operand.vmem [shape: f32[1,32], index: 7, kind: input, shape index: {}]   ;;  %s3903_s8 = inlined_call_operand.vmem [shape: bf16[32,64], index: 8, kind: input, shape index: {}]   ;;  %s3904_s9 = inlined_call_operand.vmem [shape: f32[1,64], index: 9, kind: input, shape index: {}]   ;;  %s3905_s10 = inlined_call_operand.vmem [shape: bf16[128,32], index: 10, kind: input, shape index: {}]   ;;  %s3906_s11 = inlined_call_operand.vmem [shape: f32[1,32], index: 11, kind: input, shape index: {}]   ;;  %s3907_s12 = inlined_call_operand.vmem [shape: bf16[32,128], index: 12, kind: input, shape index: {}]   ;;  %s3908_s13 = inlined_call_operand.vmem [shape: f32[1,128], index: 13, kind: input, shape index: {}]   ;;  %s3909_s14 = inlined_call_operand.hbm [shape: f32[8,128], index: 14, kind: output, shape index: {0}]   ;;  %s3910_s15 = inlined_call_operand.hbm [shape: f32[8,128], index: 15, kind: output, shape index: {1}]   ;;  %s3911_s16 = inlined_call_operand.hbm [shape: f32[8,64], index: 16, kind: output, shape index: {2}]   ;;  %s3912_s17 = inlined_call_operand.hbm [shape: f32[8,64], index: 17, kind: output, shape index: {3}]   ;;  %s3913_s18 = inlined_call_operand.hbm [shape: f32[1,1], index: 18, kind: output, shape index: {4}]  }
   0x1   :  { %3922 = sst [smem:[#allocation25_spill]] %s3895_s0 }
   0x2   :  { %3923 = sst [smem:[#allocation26_spill]] %s3896_s1 }
   0x3   :  { %3924 = sst [smem:[#allocation27_spill]] %s3897_s2 }
   0x4   :  { %24 = vsyncpa [#allocation8], 0 }
   0x5   :  { %25 = vsyncpa [#allocation11], 0 }
   0x6   :  { %26 = vsyncpa [#allocation14], 0  ;;  %s3925_s29 = sld [smem:[#allocation27_spill]]  ;;  %v2916_v1 = vmov 0.0   ;;  %vm2917_vm0 = vmmov 0   ;;  %vm155_vm1 = vcmask 523264  }
   0x7   :  { %2514 = vmatprep.subr.bf16.mxu1 %v2916_v1  ;;  %110 = vst [vmem:[#allocation5] sm:$0x1] %v2916_v1  ;;  %111 = vst [vmem:[#allocation6] sm:$0x1] %v2916_v1  ;;  %2554 = vmatprep.subr.bf16.mxu0 %v2916_v1  ;;  %s3926_s23 = sld [smem:[#allocation25_spill]] }
   0x8   :  { %2522 = vmatprep.mubr.msk.bf16.mxu1 %vm2917_vm0, %v2916_v1  ;;  %2558 = vmatprep.mubr.msk.bf16.mxu0 %vm2917_vm0, %v2916_v1 }
   0xc   :  { %v3023_v0 = vld [vmem:[%s3925_s29 + $0x18] sm:$0xff]   ;;  %v3033_v2 = vld [vmem:[%s3925_s29 + $0x10] sm:$0xff]   ;;  %v3043_v3 = vld [vmem:[%s3925_s29 + $0x8] sm:$0xff]  }
   0xd   :  { %2515 = vmatpush3.bf16.msra.mxu1 %v3023_v0  ;;  %v3050_v4 = vld [vmem:[%s3925_s29] sm:$0xff]  }
   0xe   :  { %2516 = vmatprep.subr.bf16.mxu1 %v2916_v1  ;;  %v114_v5 = vld [vmem:[%s3926_s23] sm:$0xff] }
   0xf   :  { %v115_v6 = vpack.c.bf16 %v114_v5, %v114_v5 }
  0x11   :  { %2517 = vmatpush3.bf16.msra.mxu1 %v3033_v2 }
  0x12   :  { %2518 = vmatprep.subr.bf16.mxu1 %v2916_v1 }
  0x15   :  { %2519 = vmatpush3.bf16.msra.mxu1 %v3043_v3 }
  0x16   :  { %2520 = vmatprep.subr.bf16.mxu1 %v2916_v1 }
  0x19   :  { %2521 = vmatpush3.bf16.msra.mxu1 %v3050_v4 }
  0x1a   :  { %2526 = vmatprep.subr.bf16.mxu1 %v2916_v1 }
  0x1c   :  { %2523 = vmatmul.mubr.msk.bf16.vlgmr.msra.gmra.mxu1 %vm155_vm1, %v115_v6 }
  0x1d   :  { %2530 = vmatprep.mubr.msk.bf16.mxu1 %vm2917_vm0, %v2916_v1 }
  0x1e   :  { %27 = vsyncpa [#allocation9], 0  ;;  %v3065_v7 = vld [vmem:[%s3899_s4 + $0x8] sm:$0xff]   ;;  %v3072_v8 = vld [vmem:[%s3899_s4] sm:$0xff]   ;;  %vm224_vm2 = vcmask 261120   ;;  %s3927_s20 = sld [smem:[#allocation26_spill]] }
  0x1f   :  { %2527 = vmatpush3.bf16.msra.mxu1 %v3065_v7  ;;  %v3079_v9 = vld [vmem:[%s3898_s3] ss:$0 sm:$0xff]  ;;  %v3085_v15 = vld [vmem:[%s3901_s6 + $0x38] sm:$0xff]   ;;  %v3092_v18 = vld [vmem:[%s3901_s6 + $0x30] sm:$0xff]   ;;  %vm940_vm3 = vcmask 64512   ;;  %vm77_vm4 = vcmask 7168  }
  0x20   :  { %2528 = vmatprep.subr.bf16.mxu1 %v2916_v1  ;;  %v3101_v19 = vld [vmem:[%s3901_s6 + $0x28] sm:$0xff]   ;;  %v3108_v20 = vld [vmem:[%s3901_s6 + $0x20] sm:$0xff]   ;;  %v3115_v21 = vld [vmem:[%s3901_s6 + $0x18] sm:$0xff]   ;;  %79 = vst.msk [vmem:[#allocation3 + $0x8] sm:$0xff] %vm77_vm4, %v2916_v1  ;;  %s2921_s22 = smov [#allocation7]  }
  0x21   :  { %v3122_v22 = vld [vmem:[%s3901_s6 + $0x10] sm:$0xff]   ;;  %v3129_v23 = vld [vmem:[%s3901_s6 + $0x8] sm:$0xff]   ;;  %v3137_v24 = vld [vmem:[%s3901_s6] sm:$0xff]   ;;  %78 = vst.msk [vmem:[#allocation3] sm:$0xff] %vm77_vm4, %v2916_v1  ;;  %s2233_s2 = sshll.u32 %s2921_s22, 4  ;;  %s2234_s2 = int_to_ptr.vmem [resolvable:$true] %s2233_s2 }
  0x22   :  { %v3144_v25 = vld [vmem:[%s3903_s8 + $0x8] sm:$0xff]   ;;  %v3151_v26 = vld [vmem:[%s3900_s5] ss:$0 sm:$0xff]  ;;  %v3172_v40 = vld [vmem:[%s3905_s10 + $0x38] sm:$0xff]   ;;  %80 = vst.msk [vmem:[#allocation3 + $0x10] sm:$0xff] %vm77_vm4, %v2916_v1 }
  0x23   :  { %2529 = vmatpush3.bf16.msra.mxu1 %v3072_v8  ;;  %2555 = vmatpush3.bf16.msra.mxu0 %v3144_v25  ;;  %v3159_v33 = vld [vmem:[%s3903_s8] sm:$0xff]   ;;  %v3179_v43 = vld [vmem:[%s3905_s10 + $0x30] sm:$0xff]   ;;  %v3188_v44 = vld [vmem:[%s3905_s10 + $0x28] sm:$0xff]   ;;  %81 = vst.msk [vmem:[#allocation3 + $0x18] sm:$0xff] %vm77_vm4, %v2916_v1 }
  0x24   :  { %2534 = vmatprep.subr.bf16.mxu1 %v2916_v1  ;;  %2556 = vmatprep.subr.bf16.mxu0 %v2916_v1  ;;  %v3166_v34 = vld [vmem:[%s3902_s7] ss:$0 sm:$0xff]  ;;  %v3202_v46 = vld [vmem:[%s3905_s10 + $0x18] sm:$0xff]   ;;  %v3209_v47 = vld [vmem:[%s3905_s10 + $0x10] sm:$0xff]   ;;  %82 = vst.msk [vmem:[#allocation3 + $0x20] sm:$0xff] %vm77_vm4, %v2916_v1 }
  0x25   :  { %v3195_v45 = vld [vmem:[%s3905_s10 + $0x20] sm:$0xff]   ;;  %v3216_v48 = vld [vmem:[%s3905_s10 + $0x8] sm:$0xff]   ;;  %83 = vst.msk [vmem:[#allocation3 + $0x28] sm:$0xff] %vm77_vm4, %v2916_v1  ;;  %84 = vst.msk [vmem:[#allocation3 + $0x30] sm:$0xff] %vm77_vm4, %v2916_v1 }
  0x26   :  { %v3223_v49 = vld [vmem:[%s3905_s10] sm:$0xff]   ;;  %v3237_v50 = vld [vmem:[%s3907_s12 + $0x8] sm:$0xff]   ;;  %85 = vst.msk [vmem:[#allocation3 + $0x38] sm:$0xff] %vm77_vm4, %v2916_v1  ;;  %86 = vst.msk [vmem:[#allocation3 + $0x40] sm:$0xff] %vm77_vm4, %v2916_v1 }
  0x27   :  { %2557 = vmatpush3.bf16.msra.mxu0 %v3159_v33  ;;  %v3244_v51 = vld [vmem:[%s3907_s12] sm:$0xff]   ;;  %87 = vst.msk [vmem:[#allocation3 + $0x48] sm:$0xff] %vm77_vm4, %v2916_v1  ;;  %88 = vst.msk [vmem:[#allocation3 + $0x50] sm:$0xff] %vm77_vm4, %v2916_v1 }
  0x28   :  { %2562 = vmatprep.subr.bf16.mxu0 %v2916_v1  ;;  %v3251_v52 = vld [vmem:[%s3904_s9] ss:$0 sm:$0xff]  ;;  %89 = vst.msk [vmem:[#allocation3 + $0x58] sm:$0xff] %vm77_vm4, %v2916_v1  ;;  %90 = vst.msk [vmem:[#allocation3 + $0x60] sm:$0xff] %vm77_vm4, %v2916_v1 }
  0x29   :  { %v3258_v58 = vld [vmem:[%s3906_s11] ss:$0 sm:$0xff]  ;;  %91 = vst.msk [vmem:[#allocation3 + $0x68] sm:$0xff] %vm77_vm4, %v2916_v1  ;;  %92 = vst.msk [vmem:[#allocation3 + $0x70] sm:$0xff] %vm77_vm4, %v2916_v1 }
  0x2a   :  { %93 = vst.msk [vmem:[#allocation3 + $0x78] sm:$0xff] %vm77_vm4, %v2916_v1  ;;  %94 = vst.msk [vmem:[#allocation4] sm:$0xff] %vm77_vm4, %v2916_v1 }
  0x2b   :  { %95 = vst.msk [vmem:[#allocation4 + $0x8] sm:$0xff] %vm77_vm4, %v2916_v1  ;;  %96 = vst.msk [vmem:[#allocation4 + $0x10] sm:$0xff] %vm77_vm4, %v2916_v1 }
  0x2c   :  { %97 = vst.msk [vmem:[#allocation4 + $0x18] sm:$0xff] %vm77_vm4, %v2916_v1  ;;  %98 = vst.msk [vmem:[#allocation4 + $0x20] sm:$0xff] %vm77_vm4, %v2916_v1 }
  0x2d   :  { %99 = vst.msk [vmem:[#allocation4 + $0x28] sm:$0xff] %vm77_vm4, %v2916_v1  ;;  %100 = vst.msk [vmem:[#allocation4 + $0x30] sm:$0xff] %vm77_vm4, %v2916_v1 }
  0x2e   :  { %101 = vst.msk [vmem:[#allocation4 + $0x38] sm:$0xff] %vm77_vm4, %v2916_v1  ;;  %102 = vst.msk [vmem:[#allocation4 + $0x40] sm:$0xff] %vm77_vm4, %v2916_v1 }
  0x2f   :  { %103 = vst.msk [vmem:[#allocation4 + $0x48] sm:$0xff] %vm77_vm4, %v2916_v1  ;;  %104 = vst.msk [vmem:[#allocation4 + $0x50] sm:$0xff] %vm77_vm4, %v2916_v1 }
  0x30   :  { %105 = vst.msk [vmem:[#allocation4 + $0x58] sm:$0xff] %vm77_vm4, %v2916_v1  ;;  %106 = vst.msk [vmem:[#allocation4 + $0x60] sm:$0xff] %vm77_vm4, %v2916_v1 }
  0x31   :  { %107 = vst.msk [vmem:[#allocation4 + $0x68] sm:$0xff] %vm77_vm4, %v2916_v1  ;;  %108 = vst.msk [vmem:[#allocation4 + $0x70] sm:$0xff] %vm77_vm4, %v2916_v1 }
  0x32   :  { %109 = vst.msk [vmem:[#allocation4 + $0x78] sm:$0xff] %vm77_vm4, %v2916_v1 }
  0xdc   :  { %v193_v10 = vpop.f32.mrf.mxu1 }
  0xdd   :  { %v194_v11 = vadd.f32 %v3079_v9, %v193_v10 }
  0xde   :  { %v2524_v12 = vpop.f32.mrf.mxu1 }
  0xdf   :  { %v199_v13 = vmax.f32 %v194_v11, 0.0 }
  0xe0   :  { %v196_v14 = vpop.f32.mrf.mxu1 }
  0xe1   :  { %v200_v16 = vpack.c.bf16 %v199_v13, %v199_v13 }
  0xe2   :  { %v2525_v17 = vpop.f32.mrf.mxu1 }
  0xe3   :  { %2531 = vmatmul.mubr.msk.bf16.vlgmr.msra.gmra.mxu1 %vm224_vm2, %v200_v16 }
  0xe4   :  { %2535 = vmatpush3.bf16.msra.mxu1 %v3085_v15  ;;  %2550 = vmatprep.mubr.msk.bf16.mxu1 %vm2917_vm0, %v2916_v1 }
  0xe5   :  { %2536 = vmatprep.subr.bf16.mxu1 %v2916_v1 }
  0xe8   :  { %2537 = vmatpush3.bf16.msra.mxu1 %v3092_v18 }
  0xe9   :  { %2538 = vmatprep.subr.bf16.mxu1 %v2916_v1 }
  0xec   :  { %2539 = vmatpush3.bf16.msra.mxu1 %v3101_v19 }
  0xed   :  { %2540 = vmatprep.subr.bf16.mxu1 %v2916_v1 }
  0xf0   :  { %2541 = vmatpush3.bf16.msra.mxu1 %v3108_v20 }
  0xf1   :  { %2542 = vmatprep.subr.bf16.mxu1 %v2916_v1 }
  0xf4   :  { %2543 = vmatpush3.bf16.msra.mxu1 %v3115_v21 }
  0xf5   :  { %2544 = vmatprep.subr.bf16.mxu1 %v2916_v1 }
  0xf8   :  { %2545 = vmatpush3.bf16.msra.mxu1 %v3122_v22 }
  0xf9   :  { %2546 = vmatprep.subr.bf16.mxu1 %v2916_v1 }
  0xfc   :  { %2547 = vmatpush3.bf16.msra.mxu1 %v3129_v23 }
  0xfd   :  { %2548 = vmatprep.subr.bf16.mxu1 %v2916_v1 }
 0x100   :  { %2549 = vmatpush3.bf16.msra.mxu1 %v3137_v24 }
 0x101   :  { %2582 = vmatprep.subr.bf16.mxu1 %v2916_v1 }
 0x1a3   :  { %v262_v27 = vpop.f32.mrf.mxu1 }
 0x1a4   :  { %v263_v28 = vadd.f32 %v3151_v26, %v262_v27 }
 0x1a5   :  { %v2532_v29 = vpop.f32.mrf.mxu1 }
 0x1a6   :  { %v268_v30 = vpack.c.bf16 %v263_v28, %v263_v28  ;;  %888 = vst [vmem:[#allocation7] sm:$0xff] %v263_v28 }
 0x1a7   :  { %v265_v31 = vpop.f32.mrf.mxu1 }
 0x1a8   :  { %2551 = vmatmul.mubr.bf16.vlgmr.msra.gmra.mxu1 %v268_v30 }
 0x1a9   :  { %v2533_v32 = vpop.f32.mrf.mxu1  ;;  %2586 = vmatprep.mubr.msk.bf16.mxu1 %vm2917_vm0, %v2916_v1  ;;  %2583 = vmatpush3.bf16.msra.mxu1 %v3237_v50 }
 0x1aa   :  { %2584 = vmatprep.subr.bf16.mxu1 %v2916_v1 }
 0x1ad   :  { %2585 = vmatpush3.bf16.msra.mxu1 %v3244_v51 }
 0x1ae   :  { %2590 = vmatprep.subr.bf16.mxu1 %v2916_v1 }
 0x268   :  { %v374_v35 = vpop.f32.mrf.mxu1 }
 0x269   :  { %v375_v36 = vadd.f32 %v3166_v34, %v374_v35 }
 0x26a   :  { %v2552_v37 = vpop.f32.mrf.mxu1 }
 0x26b   :  { %v380_v38 = vmax.f32 %v375_v36, 0.0 }
 0x26c   :  { %v377_v39 = vpop.f32.mrf.mxu1 }
 0x26d   :  { %v381_v41 = vpack.c.bf16 %v380_v38, %v380_v38 }
 0x26e   :  { %v2553_v42 = vpop.f32.mrf.mxu1 }
 0x26f   :  { %2559 = vmatmul.mubr.msk.bf16.vlgmr.msra.gmra.mxu0 %vm224_vm2, %v381_v41  ;;  %v2918_v42 = vmov 1.0  }
 0x270   :  { %2563 = vmatpush3.bf16.msra.mxu0 %v3172_v40  ;;  %2578 = vmatprep.mubr.msk.bf16.mxu0 %vm2917_vm0, %v2916_v1 }
 0x271   :  { %2564 = vmatprep.subr.bf16.mxu0 %v2916_v1 }
 0x274   :  { %2565 = vmatpush3.bf16.msra.mxu0 %v3179_v43 }
 0x275   :  { %2566 = vmatprep.subr.bf16.mxu0 %v2916_v1 }
 0x278   :  { %2567 = vmatpush3.bf16.msra.mxu0 %v3188_v44 }
 0x279   :  { %2568 = vmatprep.subr.bf16.mxu0 %v2916_v1 }
 0x27c   :  { %2569 = vmatpush3.bf16.msra.mxu0 %v3195_v45 }
 0x27d   :  { %2570 = vmatprep.subr.bf16.mxu0 %v2916_v1 }
 0x280   :  { %2571 = vmatpush3.bf16.msra.mxu0 %v3202_v46 }
 0x281   :  { %2572 = vmatprep.subr.bf16.mxu0 %v2916_v1 }
 0x284   :  { %2573 = vmatpush3.bf16.msra.mxu0 %v3209_v47 }
 0x285   :  { %2574 = vmatprep.subr.bf16.mxu0 %v2916_v1 }
 0x288   :  { %2575 = vmatpush3.bf16.msra.mxu0 %v3216_v48 }
 0x289   :  { %2576 = vmatprep.subr.bf16.mxu0 %v2916_v1 }
 0x28c   :  { %2577 = vmatpush3.bf16.msra.mxu0 %v3223_v49 }
 0x28d   :  { %2602 = vmatprep.subr.bf16.mxu0 %v2916_v1 }
 0x28f   :  { %2579 = vmatmul.mubr.bf16.vlgmr.msra.gmra.mxu0 %v268_v30 }
 0x290   :  { %2603 = vmatpush3.bf16.msra.mxu0 %v3065_v7  ;;  %2606 = vmatprep.mubr.msk.bf16.mxu0 %vm2917_vm0, %v2916_v1  ;;  %v627_v7 = vld [vmem:[%s3927_s20] sm:$0xff] }
 0x291   :  { %2604 = vmatprep.subr.bf16.mxu0 %v2916_v1 }
 0x294   :  { %2605 = vmatpush3.bf16.msra.mxu0 %v3072_v8  ;;  %v628_v8 = vpack.c.bf16 %v627_v7, %v627_v7 }
 0x295   :  { %2610 = vmatprep.subr.bf16.mxu0 %v2916_v1 }
 0x32f   :  { %v442_v53 = vpop.f32.mrf.mxu0 }
 0x330   :  { %v443_v54 = vadd.f32 %v3251_v52, %v442_v53 }
 0x331   :  { %v2560_v55 = vpop.f32.mrf.mxu0 }
 0x332   :  { %890 = vst.msk [vmem:[#allocation12] sm:$0xff] %vm155_vm1, %v443_v54 }
 0x333   :  { %v445_v56 = vpop.f32.mrf.mxu0 }
 0x335   :  { %v2561_v57 = vpop.f32.mrf.mxu0 }
 0x34f   :  { %v553_v59 = vpop.f32.mrf.mxu0 }
 0x350   :  { %v554_v60 = vadd.f32 %v3258_v58, %v553_v59 }
 0x351   :  { %v2580_v61 = vpop.f32.mrf.mxu0 }
 0x352   :  { %v559_v62 = vmax.f32 %v554_v60, 0.0 }
 0x353   :  { %v556_v63 = vpop.f32.mrf.mxu0 }
 0x354   :  { %v560_v5 = vpack.c.bf16 %v559_v62, %v559_v62 }
 0x355   :  { %v2581_v6 = vpop.f32.mrf.mxu0 }
 0x356   :  { %2587 = vmatmul.mubr.msk.bf16.vlgmr.msra.gmra.mxu1 %vm224_vm2, %v560_v5  ;;  %v1166_v6 = vld [vmem:[#allocation3] sm:$0xff] }
 0x357   :  { %2591 = vmatpush3.bf16.msra.mxu1 %v3023_v0  ;;  %2598 = vmatprep.mubr.msk.bf16.mxu1 %vm2917_vm0, %v2916_v1  ;;  %v3285_v0 = vld [vmem:[%s3908_s13] ss:$0 sm:$0xff]  ;;  %s2920_s13 = smov [#allocation10]  }
 0x358   :  { %2592 = vmatprep.subr.bf16.mxu1 %v2916_v1  ;;  %s2243_s21 = sshll.u32 %s2920_s13, 4  ;;  %s2244_s21 = int_to_ptr.vmem [resolvable:$true] %s2243_s21 }
 0x359   :  { %s2820_s23 = scalar_lea.vmem %s2244_s21, 128  ;;  %p2825_p1 = scmp.lt.s32.totalorder %s2244_s21, %s2244_s21 }
 0x35a   :  { %p2821_p0 = scmp.ne.s32.totalorder %s2244_s21, %s2820_s23  ;;  %p2826_p2 = scmp.lt.s32.totalorder %s2820_s23, %s2820_s23 }
 0x35b   :  { %2593 = vmatpush3.bf16.msra.mxu1 %v3033_v2 }
 0x35c   :  { %2594 = vmatprep.subr.bf16.mxu1 %v2916_v1  ;;  %p2827_p3 = por %p2826_p2, %p2825_p1 }
 0x35e   :  { %p2828_p4 = pnand %p2827_p3, %p2821_p0 }
 0x35f   :  { %2595 = vmatpush3.bf16.msra.mxu1 %v3043_v3 }
 0x360   :  { %2596 = vmatprep.subr.bf16.mxu1 %v2916_v1 }
 0x363   :  { %2597 = vmatpush3.bf16.msra.mxu1 %v3050_v4 }
 0x364   :  { %2630 = vmatprep.subr.bf16.mxu1 %v2916_v1 }
 0x366   :  { %2599 = vmatmul.mubr.msk.bf16.vlgmr.msra.gmra.mxu1 %vm155_vm1, %v628_v8  ;;  %v1169_v8 = vld [vmem:[#allocation3 + $0x18] sm:$0xff] }
 0x367   :  { %2631 = vmatpush3.bf16.msra.mxu1 %v3144_v25  ;;  %2634 = vmatprep.mubr.msk.bf16.mxu1 %vm2917_vm0, %v2916_v1 }
 0x368   :  { %2632 = vmatprep.subr.bf16.mxu1 %v2916_v1 }
 0x36b   :  { %2633 = vmatpush3.bf16.msra.mxu1 %v3159_v33 }
 0x36c   :  { %2638 = vmatprep.subr.bf16.mxu1 %v2916_v1 }
 0x416   :  { %v621_v2 = vpop.f32.mrf.mxu1 }
 0x417   :  { %v622_v3 = vadd.f32 %v3285_v0, %v621_v2 }
 0x418   :  { %v2588_v4 = vpop.f32.mrf.mxu1 }
 0x419   :  { %908 = vxpose.xlu0.b32.start.end [1/1] (short) %v622_v3, 128 }
 0x41a   :  { %v624_v10 = vpop.f32.mrf.mxu1 }
 0x41c   :  { %v2589_v11 = vpop.f32.mrf.mxu1 }
 0x41d   :  { %v1171_v11 = vld [vmem:[#allocation3 + $0x28] sm:$0xff] }
 0x426   :  { %v666_v12 = vpop.f32.mrf.mxu1 }
 0x427   :  { %v667_v13 = vadd.f32 %v3079_v9, %v666_v12  ;;  %v1376_v9 = vmul.f32 %v622_v3, %v622_v3  ;;  %v1168_v3 = vld [vmem:[#allocation3 + $0x10] sm:$0xff] }
 0x428   :  { %v2600_v14 = vpop.f32.mrf.mxu1 }
 0x429   :  { %v672_v16 = vmax.f32 %v667_v13, 0.0  ;;  %v1170_v14 = vld [vmem:[#allocation3 + $0x20] sm:$0xff] }
 0x42a   :  { %v669_v17 = vpop.f32.mrf.mxu1 }
 0x42b   :  { %v673_v25 = vpack.c.bf16 %v672_v16, %v672_v16 }
 0x42c   :  { %v2601_v27 = vpop.f32.mrf.mxu1 }
 0x42d   :  { %2607 = vmatmul.mubr.msk.bf16.vlgmr.msra.gmra.mxu0 %vm224_vm2, %v673_v25  ;;  %v1173_v27 = vld [vmem:[#allocation3 + $0x38] sm:$0xff] }
 0x42e   :  { %2611 = vmatpush3.bf16.msra.mxu0 %v3085_v15  ;;  %2626 = vmatprep.mubr.msk.bf16.mxu0 %vm2917_vm0, %v2916_v1 }
 0x42f   :  { %2612 = vmatprep.subr.bf16.mxu0 %v2916_v1 }
 0x432   :  { %2613 = vmatpush3.bf16.msra.mxu0 %v3092_v18 }
 0x433   :  { %2614 = vmatprep.subr.bf16.mxu0 %v2916_v1 }
 0x436   :  { %2615 = vmatpush3.bf16.msra.mxu0 %v3101_v19 }
 0x437   :  { %2616 = vmatprep.subr.bf16.mxu0 %v2916_v1 }
 0x43a   :  { %2617 = vmatpush3.bf16.msra.mxu0 %v3108_v20 }
 0x43b   :  { %2618 = vmatprep.subr.bf16.mxu0 %v2916_v1 }
 0x43e   :  { %2619 = vmatpush3.bf16.msra.mxu0 %v3115_v21 }
 0x43f   :  { %2620 = vmatprep.subr.bf16.mxu0 %v2916_v1 }
 0x442   :  { %2621 = vmatpush3.bf16.msra.mxu0 %v3122_v22 }
 0x443   :  { %2622 = vmatprep.subr.bf16.mxu0 %v2916_v1 }
 0x446   :  { %2623 = vmatpush3.bf16.msra.mxu0 %v3129_v23 }
 0x447   :  { %2624 = vmatprep.subr.bf16.mxu0 %v2916_v1 }
 0x44a   :  { %2625 = vmatpush3.bf16.msra.mxu0 %v3137_v24 }
 0x44b   :  { %2658 = vmatprep.subr.bf16.mxu0 %v2916_v1 }
 0x456   :  { %1377 = vxpose.xlu0.b32.start.end [1/1] (short) %v1376_v9, 128 }
 0x495   :  { %v3314_v23 = vpop.trf.xlu0 }
 0x499   :  { %v3316_v24 = vpop.trf.xlu0 }
 0x4ed   :  { %v711_v15 = vpop.f32.mrf.mxu0 }
 0x4ee   :  { %v712_v18 = vadd.f32 %v3151_v26, %v711_v15  ;;  %v3318_v26 = vpop.trf.xlu0 }
 0x4ef   :  { %v2608_v19 = vpop.f32.mrf.mxu0 }
 0x4f0   :  { %v717_v20 = vpack.c.bf16 %v712_v18, %v712_v18  ;;  %889 = vst [vmem:[#allocation10] sm:$0xff] %v712_v18 }
 0x4f1   :  { %v714_v21 = vpop.f32.mrf.mxu0 }
 0x4f2   :  { %2627 = vmatmul.mubr.bf16.vlgmr.msra.gmra.mxu0 %v717_v20  ;;  %v3320_v29 = vpop.trf.xlu0 }
 0x4f3   :  { %v2609_v22 = vpop.f32.mrf.mxu0  ;;  %2659 = vmatpush3.bf16.msra.mxu0 %v3237_v50  ;;  %2662 = vmatprep.mubr.msk.bf16.mxu0 %vm2917_vm0, %v2916_v1 }
 0x4f4   :  { %2660 = vmatprep.subr.bf16.mxu0 %v2916_v1 }
 0x4f6   :  { %v3323_v37 = vpop.trf.xlu0 }
 0x4f7   :  { %2661 = vmatpush3.bf16.msra.mxu0 %v3244_v51 }
 0x4fa   :  { %v3331_v38 = vpop.trf.xlu0 }
 0x5b2   :  { %v752_v28 = vpop.f32.mrf.mxu0 }
 0x5b3   :  { %v753_v30 = vadd.f32 %v3166_v34, %v752_v28  ;;  %v3336_v34 = vpop.trf.xlu0 }
 0x5b4   :  { %v2628_v31 = vpop.f32.mrf.mxu0 }
 0x5b5   :  { %v758_v32 = vmax.f32 %v753_v30, 0.0  ;;  %v1175_v30 = vld [vmem:[#allocation3 + $0x48] sm:$0xff] }
 0x5b6   :  { %v755_v33 = vpop.f32.mrf.mxu0 }
 0x5b7   :  { %v759_v35 = vpack.c.bf16 %v758_v32, %v758_v32  ;;  %v3341_v39 = vpop.trf.xlu0  ;;  %v1174_v33 = vld [vmem:[#allocation3 + $0x40] sm:$0xff] }
 0x5b8   :  { %v2629_v36 = vpop.f32.mrf.mxu0 }
 0x5b9   :  { %2635 = vmatmul.mubr.msk.bf16.vlgmr.msra.gmra.mxu1 %vm224_vm2, %v759_v35 }
 0x5ba   :  { %2639 = vmatpush3.bf16.msra.mxu1 %v3172_v40  ;;  %2654 = vmatprep.mubr.msk.bf16.mxu1 %vm2917_vm0, %v2916_v1 }
 0x5bb   :  { %2640 = vmatprep.subr.bf16.mxu1 %v2916_v1  ;;  %v3346_v40 = vpop.trf.xlu0 }
 0x5be   :  { %2641 = vmatpush3.bf16.msra.mxu1 %v3179_v43 }
 0x5bf   :  { %2642 = vmatprep.subr.bf16.mxu1 %v2916_v1  ;;  %v3351_v41 = vpop.trf.xlu0 }
 0x5c2   :  { %2643 = vmatpush3.bf16.msra.mxu1 %v3188_v44 }
 0x5c3   :  { %2644 = vmatprep.subr.bf16.mxu1 %v2916_v1  ;;  %v3357_v43 = vpop.trf.xlu0 }
 0x5c6   :  { %2645 = vmatpush3.bf16.msra.mxu1 %v3195_v45 }
 0x5c7   :  { %2646 = vmatprep.subr.bf16.mxu1 %v2916_v1  ;;  %v3363_v44 = vpop.trf.xlu0 }
 0x5ca   :  { %2647 = vmatpush3.bf16.msra.mxu1 %v3202_v46 }
 0x5cb   :  { %2648 = vmatprep.subr.bf16.mxu1 %v2916_v1  ;;  %v3369_v45 = vpop.trf.xlu0 }
 0x5ce   :  { %2649 = vmatpush3.bf16.msra.mxu1 %v3209_v47 }
 0x5cf   :  { %2650 = vmatprep.subr.bf16.mxu1 %v2916_v1  ;;  %v3379_v46 = vpop.trf.xlu0 }
 0x5d2   :  { %2651 = vmatpush3.bf16.msra.mxu1 %v3216_v48 }
 0x5d3   :  { %2652 = vmatprep.subr.bf16.mxu1 %v2916_v1  ;;  %v3385_v47 = vpop.trf.xlu0  ;;  %v1167_v1 = vld [vmem:[#allocation3 + $0x8] sm:$0xff] }
 0x5d6   :  { %2653 = vmatpush3.bf16.msra.mxu1 %v3223_v49  ;;  %v2919_v49 = vmov 0  }
 0x5d7   :  { %2692 = vmatprep.subr.mxu1 %v2918_v42  ;;  %v3393_v48 = vpop.trf.xlu0  ;;  %2758 = vset.pattern.permute.xlu1 %v2919_v49 }
 0x5d8   :  { %2759 = vset.pattern.permute.xlu0 %v2919_v49 }
 0x5d9   :  { %2655 = vmatmul.mubr.bf16.vlgmr.msra.gmra.mxu1 %v717_v20  ;;  %v1172_v20 = vld [vmem:[#allocation3 + $0x30] sm:$0xff] }
 0x5da   :  { %2693 = vmatpush3.msra.mxu1 %v2918_v42  ;;  %2694 = vmatprep.mubr.msk.f32.mxu1 %vm940_vm3, %v3314_v23 }
 0x5e1   :  { %2695 = vmatmul.mubr.msk.f32.vlgmr.msra.gmra.mxu1 %vm940_vm3, %v3316_v24 }
 0x5e2   :  { %2697 = vmatprep.mubr.msk.f32.mxu1 %vm940_vm3, %v3318_v26 }
 0x5e5   :  { %2698 = vmatmul.mubr.msk.f32.gmra.mxu1 %vm940_vm3, %v3320_v29 }
 0x5e6   :  { %2700 = vmatprep.mubr.msk.f32.mxu1 %vm940_vm3, %v3323_v37 }
 0x5e9   :  { %2701 = vmatmul.mubr.msk.f32.gmra.mxu1 %vm940_vm3, %v3331_v38 }
 0x5ea   :  { %2703 = vmatprep.mubr.msk.f32.mxu1 %vm940_vm3, %v3336_v34 }
 0x5ed   :  { %2704 = vmatmul.mubr.msk.f32.gmra.mxu1 %vm940_vm3, %v3341_v39 }
 0x5ee   :  { %2706 = vmatprep.mubr.msk.f32.mxu1 %vm940_vm3, %v3346_v40 }
 0x5f1   :  { %2707 = vmatmul.mubr.msk.f32.gmra.mxu1 %vm940_vm3, %v3351_v41 }
 0x5f2   :  { %2709 = vmatprep.mubr.msk.f32.mxu1 %vm940_vm3, %v3357_v43 }
 0x5f5   :  { %2710 = vmatmul.mubr.msk.f32.gmra.mxu1 %vm940_vm3, %v3363_v44 }
 0x5f6   :  { %2712 = vmatprep.mubr.msk.f32.mxu1 %vm940_vm3, %v3369_v45 }
 0x5f9   :  { %2713 = vmatmul.mubr.msk.f32.gmra.mxu1 %vm940_vm3, %v3379_v46 }
 0x5fa   :  { %2715 = vmatprep.mubr.msk.f32.mxu1 %vm940_vm3, %v3385_v47 }
 0x5fd   :  { %2716 = vmatmul.mubr.msk.f32.gmra.mxu1 %vm940_vm3, %v3393_v48 }
 0x679   :  { %v797_v50 = vpop.f32.mrf.mxu1 }
 0x67a   :  { %v798_v51 = vadd.f32 %v3251_v52, %v797_v50 }
 0x67b   :  { %v2636_v53 = vpop.f32.mrf.mxu1 }
 0x67c   :  { %891 = vst.msk [vmem:[#allocation13] sm:$0xff] %vm155_vm1, %v798_v51  ;;  %v1177_v51 = vld [vmem:[#allocation3 + $0x58] sm:$0xff] }
 0x67d   :  { %v800_v54 = vpop.f32.mrf.mxu1 }
 0x67f   :  { %v2637_v55 = vpop.f32.mrf.mxu1 }
 0x680   :  { %v1176_v55 = vld [vmem:[#allocation3 + $0x50] sm:$0xff] }
 0x699   :  { %v837_v56 = vpop.f32.mrf.mxu1 }
 0x69a   :  { %v838_v57 = vadd.f32 %v3258_v58, %v837_v56 }
 0x69b   :  { %v2656_v59 = vpop.f32.mrf.mxu1 }
 0x69c   :  { %v843_v60 = vmax.f32 %v838_v57, 0.0 }
 0x69d   :  { %v840_v61 = vpop.f32.mrf.mxu1 }
 0x69e   :  { %v844_v62 = vpack.c.bf16 %v843_v60, %v843_v60  ;;  %v1179_v61 = vld [vmem:[#allocation3 + $0x68] sm:$0xff] }
 0x69f   :  { %v2657_v63 = vpop.f32.mrf.mxu1 }
 0x6a0   :  { %2663 = vmatmul.mubr.msk.bf16.vlgmr.msra.gmra.mxu0 %vm224_vm2, %v844_v62 }
 0x6a1   :  { %v2696_v5 = vpop.f32.mrf.mxu1  ;;  %2668 = vmatprep.mubr.msk.f32.mxu0 %vm940_vm3, %v3314_v23 }
 0x6a2   :  { %v1328_v52 = vadd.f32 %v2696_v5, %v1167_v1  ;;  %v1178_v1 = vld [vmem:[#allocation3 + $0x60] sm:$0xff] }
 0x6a3   :  { %v1248_v7 = vpop.f32.mrf.mxu1 }
 0x6a4   :  { %1345 = vst.msk [vmem:[#allocation3 + $0x8] sm:$0xff] %vm77_vm4, %v1328_v52  ;;  %v1327_v2 = vadd.f32 %v1248_v7, %v1166_v6 }
 0x6a5   :  { %v2699_v58 = vpop.f32.mrf.mxu1 }
 0x6a6   :  { %1344 = vst.msk [vmem:[#allocation3] sm:$0xff] %vm77_vm4, %v1327_v2  ;;  %v1330_v4 = vadd.f32 %v2699_v58, %v1169_v8  ;;  %v1181_v8 = vld [vmem:[#allocation3 + $0x78] sm:$0xff] }
 0x6a7   :  { %v1258_v10 = vpop.f32.mrf.mxu1 }
 0x6a8   :  { %1347 = vst.msk [vmem:[#allocation3 + $0x18] sm:$0xff] %vm77_vm4, %v1330_v4  ;;  %v1329_v12 = vadd.f32 %v1258_v10, %v1168_v3  ;;  %v1180_v10 = vld [vmem:[#allocation3 + $0x70] sm:$0xff] }
 0x6a9   :  { %v2702_v13 = vpop.f32.mrf.mxu1 }
 0x6aa   :  { %1346 = vst.msk [vmem:[#allocation3 + $0x10] sm:$0xff] %vm77_vm4, %v1329_v12  ;;  %v1332_v16 = vadd.f32 %v2702_v13, %v1171_v11 }
 0x6ab   :  { %v1657_v17 = vld [vmem:[#allocation3 + $0x8] sm:$0xff]  ;;  %v1268_v25 = vpop.f32.mrf.mxu1 }
 0x6ac   :  { %v3473_v9 = vmul.f32 0.125, %v1657_v17  ;;  %1349 = vst.msk [vmem:[#allocation3 + $0x28] sm:$0xff] %vm77_vm4, %v1332_v16  ;;  %v1331_v15 = vadd.f32 %v1268_v25, %v1170_v14 }
 0x6ad   :  { %v1656_v18 = vld [vmem:[#allocation3] sm:$0xff]  ;;  %v2705_v19 = vpop.f32.mrf.mxu1 }
 0x6ae   :  { %1831 = vperm.xlu1 %2758, %v3473_v9   ;;  %v3477_v21 = vmul.f32 0.125, %v1656_v18  ;;  %1348 = vst.msk [vmem:[#allocation3 + $0x20] sm:$0xff] %vm77_vm4, %v1331_v15  ;;  %v1334_v22 = vadd.f32 %v2705_v19, %v1173_v27 }
 0x6af   :  { %v1659_v23 = vld [vmem:[#allocation3 + $0x18] sm:$0xff]  ;;  %v1278_v28 = vpop.f32.mrf.mxu1 }
 0x6b0   :  { %1351 = vst.msk [vmem:[#allocation3 + $0x38] sm:$0xff] %vm77_vm4, %v1334_v22  ;;  %v1333_v31 = vadd.f32 %v1278_v28, %v1172_v20  ;;  %v3482_v35 = vmul.f32 0.125, %v1659_v23 }
 0x6b1   :  { %v2708_v32 = vpop.f32.mrf.mxu1  ;;  %v1658_v49 = vld [vmem:[#allocation3 + $0x10] sm:$0xff] }
 0x6b2   :  { %1826 = vperm.xlu1 %2758, %v3477_v21   ;;  %1350 = vst.msk [vmem:[#allocation3 + $0x30] sm:$0xff] %vm77_vm4, %v1333_v31  ;;  %v1336_v36 = vadd.f32 %v2708_v32, %v1175_v30  ;;  %v3487_v56 = vmul.f32 0.125, %v1658_v49 }
 0x6b3   :  { %v1288_v50 = vpop.f32.mrf.mxu1  ;;  %v1661_v59 = vld [vmem:[#allocation3 + $0x28] sm:$0xff] }
 0x6b4   :  { %1353 = vst.msk [vmem:[#allocation3 + $0x48] sm:$0xff] %vm77_vm4, %v1336_v36  ;;  %v1335_v53 = vadd.f32 %v1288_v50, %v1174_v33  ;;  %v3492_v5 = vmul.f32 0.125, %v1661_v59 }
 0x6b5   :  { %v2711_v54 = vpop.f32.mrf.mxu1  ;;  %v1660_v52 = vld [vmem:[#allocation3 + $0x20] sm:$0xff] }
 0x6b6   :  { %1841 = vperm.xlu1 %2758, %v3482_v35   ;;  %1352 = vst.msk [vmem:[#allocation3 + $0x40] sm:$0xff] %vm77_vm4, %v1335_v53  ;;  %v1338_v57 = vadd.f32 %v2711_v54, %v1177_v51  ;;  %v3499_v11 = vmul.f32 0.125, %v1660_v52  ;;  %v1393_v51 = vpop.trf.xlu0 }
 0x6b7   :  { %v1298_v60 = vpop.f32.mrf.mxu1  ;;  %v1663_v13 = vld [vmem:[#allocation3 + $0x38] sm:$0xff] }
 0x6b8   :  { %1355 = vst.msk [vmem:[#allocation3 + $0x58] sm:$0xff] %vm77_vm4, %v1338_v57  ;;  %v1337_v62 = vadd.f32 %v1298_v60, %v1176_v55  ;;  %v3505_v17 = vmul.f32 0.125, %v1663_v13  ;;  %v1634_v13 = vld [vmem:[#allocation5] sm:$0x1] }
 0x6b9   :  { %v2714_v63 = vpop.f32.mrf.mxu1  ;;  %v1662_v25 = vld [vmem:[#allocation3 + $0x30] sm:$0xff] }
 0x6ba   :  { %1836 = vperm.xlu1 %2758, %v3487_v56   ;;  %1354 = vst.msk [vmem:[#allocation3 + $0x50] sm:$0xff] %vm77_vm4, %v1337_v62  ;;  %v1340_v6 = vadd.f32 %v2714_v63, %v1179_v61  ;;  %v3509_v27 = vmul.f32 0.125, %v1662_v25  ;;  %v1394_v53 = vpop.trf.xlu0 }
 0x6bb   :  { %v1308_v7 = vpop.f32.mrf.mxu1  ;;  %v1665_v2 = vld [vmem:[#allocation3 + $0x48] sm:$0xff] }
 0x6bc   :  { %1357 = vst.msk [vmem:[#allocation3 + $0x68] sm:$0xff] %vm77_vm4, %v1340_v6  ;;  %v1339_v58 = vadd.f32 %v1308_v7, %v1178_v1  ;;  %v3496_v3 = vmul.f32 0.125, %v1665_v2 }
 0x6bd   :  { %v2717_v4 = vpop.f32.mrf.mxu1  ;;  %v1664_v15 = vld [vmem:[#allocation3 + $0x40] sm:$0xff] }
 0x6be   :  { %1851 = vperm.xlu1 %2758, %v3492_v5   ;;  %1356 = vst.msk [vmem:[#allocation3 + $0x60] sm:$0xff] %vm77_vm4, %v1339_v58  ;;  %v1342_v12 = vadd.f32 %v2717_v4, %v1181_v8  ;;  %1871 = vperm.xlu0 %2759, %v3496_v3   ;;  %v3512_v18 = vmul.f32 0.125, %v1664_v15  ;;  %v1395_v54 = vpop.trf.xlu0 }
 0x6bf   :  { %v1318_v14 = vpop.f32.mrf.mxu1  ;;  %v1667_v19 = vld [vmem:[#allocation3 + $0x58] sm:$0xff] }
 0x6c0   :  { %1359 = vst.msk [vmem:[#allocation3 + $0x78] sm:$0xff] %vm77_vm4, %v1342_v12  ;;  %v1341_v16 = vadd.f32 %v1318_v14, %v1180_v10  ;;  %v3515_v20 = vmul.f32 0.125, %v1667_v19 }
 0x6c1   :  { %v1666_v22 = vld [vmem:[#allocation3 + $0x50] sm:$0xff] }
 0x6c2   :  { %1846 = vperm.xlu1 %2758, %v3499_v11   ;;  %1358 = vst.msk [vmem:[#allocation3 + $0x70] sm:$0xff] %vm77_vm4, %v1341_v16  ;;  %v3518_v23 = vmul.f32 0.125, %v1666_v22  ;;  %v1396_v55 = vpop.trf.xlu0 }
 0x6c3   :  { %v1669_v28 = vld [vmem:[#allocation3 + $0x68] sm:$0xff] }
 0x6c4   :  { %v3521_v30 = vmul.f32 0.125, %v1669_v28 }
 0x6c5   :  { %v1668_v31 = vld [vmem:[#allocation3 + $0x60] sm:$0xff] }
 0x6c6   :  { %1861 = vperm.xlu1 %2758, %v3505_v17   ;;  %v3524_v32 = vmul.f32 0.125, %v1668_v31  ;;  %v1397_v57 = vpop.trf.xlu0 }
 0x6c7   :  { %v1671_v33 = vld [vmem:[#allocation3 + $0x78] sm:$0xff] }
 0x6c8   :  { %v3527_v36 = vmul.f32 0.125, %v1671_v33  ;;  %v3915_v33 = vlaneseq }
 0x6c9   :  { %v1670_v49 = vld [vmem:[#allocation3 + $0x70] sm:$0xff] }
 0x6ca   :  { %1856 = vperm.xlu1 %2758, %v3509_v27   ;;  %v3530_v50 = vmul.f32 0.125, %v1670_v49  ;;  %v1398_v1 = vpop.trf.xlu0 }
 0x6ce   :  { %1866 = vperm.xlu1 %2758, %v3512_v18   ;;  %v1399_v10 = vpop.trf.xlu0 }
 0x6d2   :  { %1881 = vperm.xlu1 %2758, %v3515_v20   ;;  %v1400_v15 = vpop.trf.xlu0 }
 0x6d6   :  { %1876 = vperm.xlu1 %2758, %v3518_v23  }
 0x6da   :  { %1891 = vperm.xlu1 %2758, %v3521_v30  }
 0x6de   :  { %1886 = vperm.xlu1 %2758, %v3524_v32  }
 0x6e2   :  { %1901 = vperm.xlu1 %2758, %v3527_v36  }
 0x6e6   :  { %1896 = vperm.xlu1 %2758, %v3530_v50  }
 0x760   :  { %v882_v59 = vpop.f32.mrf.mxu0 }
 0x761   :  { %v883_v60 = vadd.f32 %v3285_v0, %v882_v59 }
 0x762   :  { %v2664_v61 = vpop.f32.mrf.mxu0 }
 0x763   :  { %v1635_v62 = vrot.slane %v883_v60, 4  ;;  %v1644_v63 = vmul.f32 %v883_v60, %v883_v60  ;;  %2666 = vmatprep.subr.mxu0 %v883_v60 }
 0x764   :  { %v885_v6 = vpop.f32.mrf.mxu0  ;;  %2667 = vmatpush3.msra.mxu0 %v883_v60 }
 0x765   :  { %v1636_v52 = vadd.f32 %v1635_v62, %v883_v60  ;;  %v1645_v7 = vrot.slane %v1644_v63, 4  ;;  %2669 = vmatmul.mubr.msk.f32.vlgmr.msra.gmra.mxu0 %vm940_vm3, %v3316_v24  ;;  %2718 = vmatprep.subr.mxu0 %v2918_v42 }
 0x766   :  { %v2665_v8 = vpop.f32.mrf.mxu0  ;;  %2671 = vmatprep.mubr.msk.f32.mxu0 %vm940_vm3, %v3318_v26  ;;  %2719 = vmatpush3.msra.mxu0 %v2918_v42  ;;  %v1643_v26 = vld [vmem:[#allocation6] sm:$0x1] }
 0x767   :  { %v1637_v0 = vrot.slane %v1636_v52, 2  ;;  %v1646_v2 = vadd.f32 %v1645_v7, %v1644_v63 }
 0x769   :  { %v1638_v58 = vadd.f32 %v1637_v0, %v1636_v52  ;;  %v1647_v4 = vrot.slane %v1646_v2, 2  ;;  %2672 = vmatmul.mubr.msk.f32.gmra.mxu0 %vm940_vm3, %v3320_v29 }
 0x76a   :  { %2674 = vmatprep.mubr.msk.f32.mxu0 %vm940_vm3, %v3323_v37  ;;  %v1401_v37 = vpop.trf.xlu0 }
 0x76b   :  { %v1639_v24 = vrot.slane %v1638_v58, 1  ;;  %v1648_v12 = vadd.f32 %v1647_v4, %v1646_v2  ;;  %v1365_v2 = vld [vmem:[#allocation4 + $0x28] sm:$0xff] }
 0x76d   :  { %v1640_v14 = vadd.f32 %v1639_v24, %v1638_v58  ;;  %v1649_v16 = vrot.slane %v1648_v12, 1  ;;  %2675 = vmatmul.mubr.msk.f32.gmra.mxu0 %vm940_vm3, %v3331_v38 }
 0x76e   :  { %2677 = vmatprep.mubr.msk.f32.mxu0 %vm940_vm3, %v3336_v34  ;;  %v1402_v38 = vpop.trf.xlu0 }
 0x76f   :  { %v1641_v42 = vadd.f32 %v1640_v14, %v1634_v13  ;;  %v1650_v25 = vadd.f32 %v1649_v16, %v1648_v12  ;;  %v1362_v12 = vld [vmem:[#allocation4 + $0x10] sm:$0xff] }
 0x771   :  { %1642 = vst [vmem:[#allocation5] sm:$0x1] %v1641_v42  ;;  %v1651_v29 = vadd.f32 %v1650_v25, %v1643_v26  ;;  %2678 = vmatmul.mubr.msk.f32.gmra.mxu0 %vm940_vm3, %v3341_v39 }
 0x772   :  { %2680 = vmatprep.mubr.msk.f32.mxu0 %vm940_vm3, %v3346_v40  ;;  %v1403_v34 = vpop.trf.xlu0 }
 0x773   :  { %1652 = vst [vmem:[#allocation6] sm:$0x1] %v1651_v29 }
 0x775   :  { %2681 = vmatmul.mubr.msk.f32.gmra.mxu0 %vm940_vm3, %v3351_v41 }
 0x776   :  { %2683 = vmatprep.mubr.msk.f32.mxu0 %vm940_vm3, %v3357_v43  ;;  %v1404_v39 = vpop.trf.xlu0 }
 0x779   :  { %2684 = vmatmul.mubr.msk.f32.gmra.mxu0 %vm940_vm3, %v3363_v44 }
 0x77a   :  { %2686 = vmatprep.mubr.msk.f32.mxu0 %vm940_vm3, %v3369_v45  ;;  %v1405_v40 = vpop.trf.xlu0  ;;  %v3582_v45 = vpop.permute.xlu1 %1831 }
 0x77d   :  { %2687 = vmatmul.mubr.msk.f32.gmra.mxu0 %vm940_vm3, %v3379_v46 }
 0x77e   :  { %2689 = vmatprep.mubr.msk.f32.mxu0 %vm940_vm3, %v3385_v47  ;;  %v1406_v41 = vpop.trf.xlu0  ;;  %v3584_v46 = vpop.permute.xlu1 %1826 }
 0x781   :  { %2690 = vmatmul.mubr.msk.f32.gmra.mxu0 %vm940_vm3, %v3393_v48 }
 0x782   :  { %2720 = vmatprep.mubr.msk.f32.mxu0 %vm940_vm3, %v1393_v51  ;;  %v1407_v43 = vpop.trf.xlu0  ;;  %v3586_v47 = vpop.permute.xlu1 %1841  ;;  %v3593_v51 = vshrl.u32 %v3915_v33, 7 }
 0x784   :  { %v3916_v59 = vsub.s32 0, %v3593_v51 }
 0x785   :  { %2721 = vmatmul.mubr.msk.f32.vlgmr.msra.gmra.mxu0 %vm940_vm3, %v1394_v53  ;;  %v1688_v53 = vld [vmem:[#allocation5] sm:$0x1] }
 0x786   :  { %2723 = vmatprep.mubr.msk.f32.mxu0 %vm940_vm3, %v1395_v54  ;;  %v1408_v44 = vpop.trf.xlu0  ;;  %v3588_v48 = vpop.permute.xlu1 %1836 }
 0x789   :  { %2724 = vmatmul.mubr.msk.f32.gmra.mxu0 %vm940_vm3, %v1396_v55 }
 0x78a   :  { %2726 = vmatprep.mubr.msk.f32.mxu0 %vm940_vm3, %v1397_v57  ;;  %v3590_v19 = vpop.permute.xlu1 %1851  ;;  %v3599_v57 = vmul.f32 0.125, %v1688_v53 }
 0x78c   :  { %v3609_v63 = vrot.slane %v3599_v57, %v3916_v59 }
 0x78d   :  { %2727 = vmatmul.mubr.msk.f32.gmra.mxu0 %vm940_vm3, %v1398_v1 }
 0x78e   :  { %2729 = vmatprep.mubr.msk.f32.mxu0 %vm940_vm3, %v1399_v10  ;;  %v1847_v22 = vpop.permute.xlu1 %1846 }
 0x78f   :  { %v3616_v8 = vmul.f32 %v3609_v63, %v1847_v22 }
 0x791   :  { %2730 = vmatmul.mubr.msk.f32.gmra.mxu0 %vm940_vm3, %v1400_v15 }
 0x792   :  { %2732 = vmatprep.mubr.msk.f32.mxu0 %vm940_vm3, %v1401_v37  ;;  %v1862_v28 = vpop.permute.xlu1 %1861 }
 0x793   :  { %v3623_v4 = vmul.f32 %v3609_v63, %v1862_v28 }
 0x795   :  { %2733 = vmatmul.mubr.msk.f32.gmra.mxu0 %vm940_vm3, %v1402_v38  ;;  %v1363_v38 = vld [vmem:[#allocation4 + $0x18] sm:$0xff] }
 0x796   :  { %2735 = vmatprep.mubr.msk.f32.mxu0 %vm940_vm3, %v1403_v34  ;;  %v1857_v31 = vpop.permute.xlu1 %1856 }
 0x797   :  { %v3626_v24 = vmul.f32 %v3609_v63, %v1857_v31 }
 0x799   :  { %2736 = vmatmul.mubr.msk.f32.gmra.mxu0 %vm940_vm3, %v1404_v39 }
 0x79a   :  { %2738 = vmatprep.mubr.msk.f32.mxu0 %vm940_vm3, %v1405_v40  ;;  %v1867_v49 = vpop.permute.xlu1 %1866 }
 0x79b   :  { %v3637_v25 = vmul.f32 %v3609_v63, %v1867_v49 }
 0x79d   :  { %2739 = vmatmul.mubr.msk.f32.gmra.mxu0 %vm940_vm3, %v1406_v41 }
 0x79e   :  { %2741 = vmatprep.mubr.msk.f32.mxu0 %vm940_vm3, %v1407_v43  ;;  %v1882_v60 = vpop.permute.xlu1 %1881 }
 0x79f   :  { %v3642_v37 = vmul.f32 %v3609_v63, %v1882_v60 }
 0x7a1   :  { %2742 = vmatmul.mubr.msk.f32.gmra.mxu0 %vm940_vm3, %v1408_v44 }
 0x7a2   :  { %v1877_v6 = vpop.permute.xlu1 %1876 }
 0x7a3   :  { %v3649_v41 = vmul.f32 %v3609_v63, %v1877_v6  ;;  %v1360_v6 = vld [vmem:[#allocation4] sm:$0xff] }
 0x7a6   :  { %v1892_v14 = vpop.permute.xlu1 %1891 }
 0x7a7   :  { %v3656_v28 = vmul.f32 %v3609_v63, %v1892_v14 }
 0x7a9   :  { %3928 = vst [vmem:[#allocation20_spill] sm:$0xff] %v3656_v28  ;;  %v1368_v28 = vld [vmem:[#allocation4 + $0x40] sm:$0xff] }
 0x7aa   :  { %v1887_v39 = vpop.permute.xlu1 %1886 }
 0x7ab   :  { %v3663_v60 = vmul.f32 %v3609_v63, %v1887_v39  ;;  %v1364_v39 = vld [vmem:[#allocation4 + $0x20] sm:$0xff] }
 0x7ad   :  { %3929 = vst [vmem:[#allocation21_spill] sm:$0xff] %v3663_v60 }
 0x825   :  { %v3595_v54 = vpop.f32.mrf.mxu0 }
 0x827   :  { %v3597_v55 = vpop.f32.mrf.mxu0 }
 0x829   :  { %v3602_v61 = vpop.f32.mrf.mxu0 }
 0x82b   :  { %v3604_v62 = vpop.f32.mrf.mxu0 }
 0x82d   :  { %v3611_v1 = vpop.f32.mrf.mxu0 }
 0x82f   :  { %v1075_v52 = vpop.f32.mrf.mxu0 }
 0x830   :  { %v3613_v7 = vmul.f32 0.125, %v1075_v52 }
 0x831   :  { %v2679_v0 = vpop.f32.mrf.mxu0 }
 0x832   :  { %v3620_v58 = vmul.f32 0.125, %v2679_v0  ;;  %v1902_v0 = vpop.permute.xlu1 %1901 }
 0x833   :  { %v1085_v10 = vpop.f32.mrf.mxu0 }
 0x834   :  { %v3630_v13 = vmul.f32 0.125, %v1085_v10 }
 0x835   :  { %v3632_v16 = vpop.f32.mrf.mxu0 }
 0x837   :  { %v1095_v42 = vpop.f32.mrf.mxu0 }
 0x838   :  { %v3639_v15 = vmul.f32 0.125, %v1095_v42  ;;  %v3670_v42 = vmul.f32 %v3609_v63, %v1902_v0 }
 0x839   :  { %v2685_v29 = vpop.f32.mrf.mxu0 }
 0x83a   :  { %v3646_v34 = vmul.f32 0.125, %v2685_v29  ;;  %3931 = vst [vmem:[#allocation23_spill] sm:$0xff] %v3670_v42  ;;  %v1367_v42 = vld [vmem:[#allocation4 + $0x38] sm:$0xff] }
 0x83b   :  { %v1105_v40 = vpop.f32.mrf.mxu0 }
 0x83c   :  { %v3653_v44 = vmul.f32 0.125, %v1105_v40 }
 0x83d   :  { %v2688_v22 = vpop.f32.mrf.mxu0 }
 0x83e   :  { %v3660_v49 = vmul.f32 0.125, %v2688_v22  ;;  %v1361_v22 = vld [vmem:[#allocation4 + $0x8] sm:$0xff] }
 0x83f   :  { %v1115_v53 = vpop.f32.mrf.mxu0 }
 0x840   :  { %v3667_v52 = vmul.f32 0.125, %v1115_v53 }
 0x841   :  { %v2691_v10 = vpop.f32.mrf.mxu0 }
 0x842   :  { %3930 = vst [vmem:[#allocation22_spill] sm:$0xff] %v3667_v52  ;;  %v3674_v29 = vmul.f32 0.125, %v2691_v10 }
 0x843   :  { %v3676_v40 = vpop.f32.mrf.mxu0 }
 0x844   :  { %3932 = vst [vmem:[#allocation24_spill] sm:$0xff] %v3674_v29 }
 0x845   :  { %v2722_v31 = vpop.f32.mrf.mxu0 }
 0x846   :  { %v1603_v53 = vadd.f32 %v2722_v31, %v1361_v22 }
 0x847   :  { %v1523_v43 = vpop.f32.mrf.mxu0 }
 0x848   :  { %1619 = vst.msk [vmem:[#allocation4 + $0x8] sm:$0xff] %vm77_vm4, %v1603_v53  ;;  %v1602_v0 = vadd.f32 %v1523_v43, %v1360_v6  ;;  %v1723_v43 = vmul.f32 %v3473_v9, %v3473_v9  ;;  %v1366_v53 = vld [vmem:[#allocation4 + $0x30] sm:$0xff]  ;;  %v1369_v9 = vld [vmem:[#allocation4 + $0x48] sm:$0xff] }
 0x849   :  { %v2725_v26 = vpop.f32.mrf.mxu0 }
 0x84a   :  { %1618 = vst.msk [vmem:[#allocation4] sm:$0xff] %vm77_vm4, %v1602_v0  ;;  %v1605_v10 = vadd.f32 %v2725_v26, %v1363_v38 }
 0x84b   :  { %v1533_v14 = vpop.f32.mrf.mxu0 }
 0x84c   :  { %1621 = vst.msk [vmem:[#allocation4 + $0x18] sm:$0xff] %vm77_vm4, %v1605_v10  ;;  %v1604_v33 = vadd.f32 %v1533_v14, %v1362_v12  ;;  %v1722_v12 = vmul.f32 %v3477_v21, %v3477_v21  ;;  %v1725_v14 = vmul.f32 %v3482_v35, %v3482_v35  ;;  %v1371_v35 = vld [vmem:[#allocation4 + $0x58] sm:$0xff] }
 0x84d   :  { %v2728_v59 = vpop.f32.mrf.mxu0 }
 0x84e   :  { %1620 = vst.msk [vmem:[#allocation4 + $0x10] sm:$0xff] %vm77_vm4, %v1604_v33  ;;  %v1607_v31 = vadd.f32 %v2728_v59, %v1365_v2 }
 0x84f   :  { %v1543_v22 = vpop.f32.mrf.mxu0  ;;  %v1691_v29 = vld [vmem:[#allocation4 + $0x8] sm:$0xff] }
 0x850   :  { %1623 = vst.msk [vmem:[#allocation4 + $0x28] sm:$0xff] %vm77_vm4, %v1607_v31  ;;  %v1606_v6 = vadd.f32 %v1543_v22, %v1364_v39  ;;  %v1707_v26 = vmul.f32 0.125, %v1691_v29 }
 0x851   :  { %v2731_v38 = vpop.f32.mrf.mxu0  ;;  %v1690_v0 = vld [vmem:[#allocation4] sm:$0xff] }
 0x852   :  { %1622 = vst.msk [vmem:[#allocation4 + $0x20] sm:$0xff] %vm77_vm4, %v1606_v6  ;;  %v1609_v33 = vadd.f32 %v2731_v38, %v1367_v42  ;;  %v1739_v59 = vsub.f32 %v1707_v26, %v1723_v43  ;;  %v1706_v2 = vmul.f32 0.125, %v1690_v0 }
 0x853   :  { %v1553_v10 = vpop.f32.mrf.mxu0  ;;  %v1693_v60 = vld [vmem:[#allocation4 + $0x18] sm:$0xff] }
 0x854   :  { %1625 = vst.msk [vmem:[#allocation4 + $0x38] sm:$0xff] %vm77_vm4, %v1609_v33  ;;  %v1608_v29 = vadd.f32 %v1553_v10, %v1366_v53  ;;  %v1759_v39 = vadd.f32 1e-05, %v1739_v59  ;;  %v1738_v31 = vsub.f32 %v1706_v2, %v1722_v12  ;;  %v1709_v22 = vmul.f32 0.125, %v1693_v60  ;;  %v1370_v12 = vld [vmem:[#allocation4 + $0x50] sm:$0xff] }
 0x855   :  { %v2734_v52 = vpop.f32.mrf.mxu0  ;;  %v1692_v21 = vld [vmem:[#allocation4 + $0x10] sm:$0xff]  ;;  %v1724_v33 = vmul.f32 %v3487_v56, %v3487_v56 }
 0x856   :  { %1624 = vst.msk [vmem:[#allocation4 + $0x30] sm:$0xff] %vm77_vm4, %v1608_v29  ;;  %v1611_v42 = vadd.f32 %v2734_v52, %v1369_v9  ;;  %2786 = vrsqrt.f32 %v1759_v39  ;;  %v1758_v43 = vadd.f32 1e-05, %v1738_v31  ;;  %v1741_v6 = vsub.f32 %v1709_v22, %v1725_v14  ;;  %v1373_v29 = vld [vmem:[#allocation4 + $0x68] sm:$0xff] }
 0x857   :  { %v1563_v26 = vpop.f32.mrf.mxu0  ;;  %v1708_v38 = vmul.f32 0.125, %v1692_v21  ;;  %v1695_v0 = vld [vmem:[#allocation4 + $0x28] sm:$0xff]  ;;  %v1727_v14 = vmul.f32 %v3492_v5, %v3492_v5  ;;  %v1726_v5 = vmul.f32 %v3499_v11, %v3499_v11 }
 0x858   :  { %1627 = vst.msk [vmem:[#allocation4 + $0x48] sm:$0xff] %vm77_vm4, %v1611_v42  ;;  %v1610_v53 = vadd.f32 %v1563_v26, %v1368_v28  ;;  %v1711_v59 = vmul.f32 0.125, %v1695_v0  ;;  %2788 = vrsqrt.f32 %v1758_v43  ;;  %v1761_v52 = vadd.f32 1e-05, %v1741_v6  ;;  %v1372_v28 = vld [vmem:[#allocation4 + $0x60] sm:$0xff]  ;;  %v1375_v26 = vld [vmem:[#allocation4 + $0x78] sm:$0xff] }
 0x859   :  { %v2737_v60 = vpop.f32.mrf.mxu0  ;;  %v1740_v10 = vsub.f32 %v1708_v38, %v1724_v33  ;;  %v1694_v39 = vld [vmem:[#allocation4 + $0x20] sm:$0xff]  ;;  %v1374_v33 = vld [vmem:[#allocation4 + $0x70] sm:$0xff] }
 0x85a   :  { %1626 = vst.msk [vmem:[#allocation4 + $0x40] sm:$0xff] %vm77_vm4, %v1610_v53  ;;  %v1613_v2 = vadd.f32 %v2737_v60, %v1371_v35  ;;  %v1743_v22 = vsub.f32 %v1711_v59, %v1727_v14  ;;  %2790 = vrsqrt.f32 %v1761_v52  ;;  %v1710_v43 = vmul.f32 0.125, %v1694_v39 }
 0x85b   :  { %v1573_v9 = vpop.f32.mrf.mxu0  ;;  %v1760_v42 = vadd.f32 1e-05, %v1740_v10  ;;  %v1697_v35 = vld [vmem:[#allocation4 + $0x38] sm:$0xff]  ;;  %v1729_v14 = vmul.f32 %v3505_v17, %v3505_v17 }
 0x85c   :  { %1629 = vst.msk [vmem:[#allocation4 + $0x58] sm:$0xff] %vm77_vm4, %v1613_v2  ;;  %v1612_v56 = vadd.f32 %v1573_v9, %v1370_v12  ;;  %v1763_v53 = vadd.f32 1e-05, %v1743_v22  ;;  %v1742_v12 = vsub.f32 %v1710_v43, %v1726_v5  ;;  %v1713_v59 = vmul.f32 0.125, %v1697_v35 }
 0x85d   :  { %v2740_v31 = vpop.f32.mrf.mxu0  ;;  %2792 = vrsqrt.f32 %v1760_v42  ;;  %v1696_v10 = vld [vmem:[#allocation4 + $0x30] sm:$0xff] }
 0x85e   :  { %1628 = vst.msk [vmem:[#allocation4 + $0x50] sm:$0xff] %vm77_vm4, %v1612_v56  ;;  %v1615_v21 = vadd.f32 %v2740_v31, %v1373_v29  ;;  %2794 = vrsqrt.f32 %v1763_v53  ;;  %v1762_v9 = vadd.f32 1e-05, %v1742_v12  ;;  %v1745_v29 = vsub.f32 %v1713_v59, %v1729_v14 }
 0x85f   :  { %v1583_v6 = vpop.f32.mrf.mxu0  ;;  %v1712_v39 = vmul.f32 0.125, %v1696_v10  ;;  %v1699_v31 = vld [vmem:[#allocation4 + $0x48] sm:$0xff] }
 0x860   :  { %1631 = vst.msk [vmem:[#allocation4 + $0x68] sm:$0xff] %vm77_vm4, %v1615_v21  ;;  %v1614_v38 = vadd.f32 %v1583_v6, %v1372_v28  ;;  %v1728_v28 = vmul.f32 %v3509_v27, %v3509_v27  ;;  %2796 = vrsqrt.f32 %v1762_v9  ;;  %v1765_v22 = vadd.f32 1e-05, %v1745_v29 }
 0x861   :  { %v2743_v0 = vpop.f32.mrf.mxu0  ;;  %v1715_v17 = vmul.f32 0.125, %v1699_v31  ;;  %v1698_v43 = vld [vmem:[#allocation4 + $0x40] sm:$0xff]  ;;  %v1731_v6 = vmul.f32 %v3496_v3, %v3496_v3  ;;  %v1730_v27 = vmul.f32 %v3512_v18, %v3512_v18  ;;  %v1733_v3 = vmul.f32 %v3515_v20, %v3515_v20 }
 0x862   :  { %1630 = vst.msk [vmem:[#allocation4 + $0x60] sm:$0xff] %vm77_vm4, %v1614_v38  ;;  %v1617_v60 = vadd.f32 %v2743_v0, %v1375_v26  ;;  %v1744_v21 = vsub.f32 %v1712_v39, %v1728_v28  ;;  %2798 = vrsqrt.f32 %v1765_v22  ;;  %v1714_v5 = vmul.f32 0.125, %v1698_v43 }
 0x863   :  { %v2787_v2 = vpop.eup %2786  ;;  %v1593_v52 = vpop.f32.mrf.mxu0  ;;  %v1747_v35 = vsub.f32 %v1715_v17, %v1731_v6  ;;  %v1701_v0 = vld [vmem:[#allocation4 + $0x58] sm:$0xff]  ;;  %v1732_v18 = vmul.f32 %v3518_v23, %v3518_v23  ;;  %v1735_v20 = vmul.f32 %v3521_v30, %v3521_v30  ;;  %v1734_v23 = vmul.f32 %v3524_v32, %v3524_v32 }
 0x864   :  { %1633 = vst.msk [vmem:[#allocation4 + $0x78] sm:$0xff] %vm77_vm4, %v1617_v60  ;;  %v1616_v11 = vadd.f32 %v1593_v52, %v1374_v33  ;;  %1949 = vperm.xlu1 %2758, %v2787_v2   ;;  %v1764_v26 = vadd.f32 1e-05, %v1744_v21  ;;  %v1746_v53 = vsub.f32 %v1714_v5, %v1730_v27  ;;  %v1717_v60 = vmul.f32 0.125, %v1701_v0 }
 0x865   :  { %v2789_v56 = vpop.eup %2788  ;;  %v1767_v33 = vadd.f32 1e-05, %v1747_v35  ;;  %v1700_v59 = vld [vmem:[#allocation4 + $0x50] sm:$0xff]  ;;  %v1736_v30 = vmul.f32 %v3530_v50, %v3530_v50 }
 0x866   :  { %1632 = vst.msk [vmem:[#allocation4 + $0x70] sm:$0xff] %vm77_vm4, %v1616_v11  ;;  %2800 = vrsqrt.f32 %v1764_v26  ;;  %v1766_v2 = vadd.f32 1e-05, %v1746_v53  ;;  %v1749_v52 = vsub.f32 %v1717_v60, %v1733_v3  ;;  %v1716_v10 = vmul.f32 0.125, %v1700_v59 }
 0x867   :  { %v2791_v42 = vpop.eup %2790  ;;  %2802 = vrsqrt.f32 %v1767_v33  ;;  %v1703_v11 = vld [vmem:[#allocation4 + $0x68] sm:$0xff]  ;;  %v1737_v53 = vmul.f32 %v3527_v36, %v3527_v36  ;;  %v1754_v36 = vld [vmem:[#allocation6] sm:$0x1] }
 0x868   :  { %1944 = vperm.xlu1 %2758, %v2789_v56   ;;  %2804 = vrsqrt.f32 %v1766_v2  ;;  %v1769_v9 = vadd.f32 1e-05, %v1749_v52  ;;  %v1748_v29 = vsub.f32 %v1716_v10, %v1732_v18  ;;  %v1719_v39 = vmul.f32 0.125, %v1703_v11 }
 0x869   :  { %v1702_v31 = vld [vmem:[#allocation4 + $0x60] sm:$0xff]  ;;  %v1756_v11 = vmul.f32 %v3599_v57, %v3599_v57 }
 0x86a   :  { %v2793_v38 = vpop.eup %2792  ;;  %2806 = vrsqrt.f32 %v1769_v9  ;;  %v1768_v28 = vadd.f32 1e-05, %v1748_v29  ;;  %v1751_v22 = vsub.f32 %v1719_v39, %v1735_v20  ;;  %v1718_v21 = vmul.f32 0.125, %v1702_v31  ;;  %v3730_v39 = vpop.permute.xlu1 %1896 }
 0x86b   :  { %v2795_v12 = vpop.eup %2794  ;;  %v1705_v5 = vld [vmem:[#allocation4 + $0x78] sm:$0xff]  ;;  %v3933_v31 = vsub.s32 0, %v3593_v51 }
 0x86c   :  { %1959 = vperm.xlu1 %2758, %v2791_v42   ;;  %2808 = vrsqrt.f32 %v1768_v28  ;;  %v1771_v43 = vadd.f32 1e-05, %v1751_v22  ;;  %v1750_v6 = vsub.f32 %v1718_v21, %v1734_v23  ;;  %v1721_v27 = vmul.f32 0.125, %v1705_v5 }
 0x86d   :  { %v2797_v14 = vpop.eup %2796  ;;  %v1704_v42 = vld [vmem:[#allocation4 + $0x70] sm:$0xff]  ;;  %v1911_v28 = vmul.f32 %v3609_v63, %v3582_v45 }
 0x86e   :  { %v1720_v26 = vmul.f32 0.125, %v1704_v42  ;;  %2810 = vrsqrt.f32 %v1771_v43  ;;  %v1753_v60 = vsub.f32 %v1721_v27, %v1737_v53  ;;  %v1910_v42 = vmul.f32 %v3609_v63, %v3584_v46 }
 0x86f   :  { %v2799_v56 = vpop.eup %2798  ;;  %v1811_v43 = vmul.f32 0.125, %v3602_v61  ;;  %v1810_v46 = vmul.f32 0.125, %v3604_v62 }
 0x870   :  { %1954 = vperm.xlu1 %2758, %v2793_v38   ;;  %v1770_v38 = vadd.f32 1e-05, %v1750_v6  ;;  %v1752_v0 = vsub.f32 %v1720_v26, %v1736_v30  ;;  %v1773_v59 = vadd.f32 1e-05, %v1753_v60  ;;  %v3934_v6 = vlaneseq }
 0x872   :  { %2812 = vrsqrt.f32 %v1770_v38  ;;  %v1772_v32 = vadd.f32 1e-05, %v1752_v0  ;;  %v3746_v26 = vand.u32 127, %v3934_v6  ;;  %v2065_v6 = vadd.s32 32, %v3593_v51 }
 0x873   :  { %v2801_v17 = vpop.eup %2800 }
 0x874   :  { %1969 = vperm.xlu1 %2758, %v2795_v12   ;;  %v2803_v35 = vpop.eup %2802  ;;  %2814 = vrsqrt.f32 %v1772_v32  ;;  %vm2079_vm6 = vcmp.eq.s32.totalorder %v3593_v51, %v3746_v26  ;;  %vm2083_vm9 = vcmp.eq.s32.totalorder %v2065_v6, %v3746_v26 }
 0x875   :  { %v2805_v33 = vpop.eup %2804  ;;  %2816 = vrsqrt.f32 %v1773_v59 }
 0x877   :  { %v2807_v12 = vpop.eup %2806 }
 0x878   :  { %1964 = vperm.xlu1 %2758, %v2797_v14   ;;  %v1755_v14 = vmul.f32 0.125, %v1754_v36 }
 0x879   :  { %v2809_v3 = vpop.eup %2808 }
 0x87a   :  { %v1757_v18 = vsub.f32 %v1755_v14, %v1756_v11 }
 0x87b   :  { %v2811_v50 = vpop.eup %2810 }
 0x87c   :  { %1979 = vperm.xlu1 %2758, %v2799_v56   ;;  %v1790_v9 = vadd.f32 1e-05, %v1757_v18  ;;  %v1809_v56 = vmul.f32 0.125, %v3595_v54  ;;  %v2062_v54 = vadd.s32 8, %v3593_v51  ;;  %v1915_v18 = vmul.f32 %v3609_v63, %v3590_v19 }
 0x87e   :  { %2818 = vrsqrt.f32 %v1790_v9  ;;  %v1927_v21 = vsub.f32 %v1809_v56, %v1911_v28  ;;  %vm2080_vm5 = vcmp.eq.s32.totalorder %v2062_v54, %v3746_v26 }
 0x87f   :  { %v2813_v2 = vpop.eup %2812 }
 0x880   :  { %1974 = vperm.xlu1 %2758, %v2801_v17   ;;  %v1808_v17 = vmul.f32 0.125, %v3597_v55  ;;  %v1913_v55 = vmul.f32 %v3609_v63, %v3586_v47 }
 0x881   :  { %v2815_v52 = vpop.eup %2814 }
 0x882   :  { %v2817_v10 = vpop.eup %2816  ;;  %v1926_v5 = vsub.f32 %v1808_v17, %v1910_v42  ;;  %v1929_v27 = vsub.f32 %v1811_v43, %v1913_v55 }
 0x884   :  { %1989 = vperm.xlu1 %2758, %v2803_v35  }
 0x888   :  { %1984 = vperm.xlu1 %2758, %v2805_v33  }
 0x88b   :  { %v2819_v29 = vpop.eup %2818 }
 0x88c   :  { %1999 = vperm.xlu1 %2758, %v2807_v12   ;;  %v3735_v20 = vrot.slane %v2819_v29, %v3933_v31  ;;  %v1912_v12 = vmul.f32 %v3609_v63, %v3588_v48 }
 0x88e   :  { %v1928_v36 = vsub.f32 %v1810_v46, %v1912_v12 }
 0x890   :  { %1994 = vperm.xlu1 %2758, %v2809_v3  }
 0x894   :  { %2009 = vperm.xlu1 %2758, %v2811_v50   ;;  %v1813_v50 = vmul.f32 0.125, %v3611_v1  ;;  %v2064_v1 = vadd.s32 24, %v3593_v51 }
 0x896   :  { %v1931_v31 = vsub.f32 %v1813_v50, %v1915_v18  ;;  %vm2082_vm8 = vcmp.eq.s32.totalorder %v2064_v1, %v3746_v26 }
 0x898   :  { %2004 = vperm.xlu1 %2758, %v2813_v2  }
 0x89c   :  { %2014 = vperm.xlu1 %2758, %v2815_v52   ;;  %v2063_v52 = vadd.s32 16, %v3593_v51 }
 0x89e   :  { %vm2081_vm7 = vcmp.eq.s32.totalorder %v2063_v52, %v3746_v26  ;;  %v1817_v52 = vmul.f32 0.125, %v3632_v16 }
 0x8a0   :  { %2019 = vperm.xlu1 %2758, %v2817_v10  }
 0x8df   :  { %v1950_v22 = vpop.permute.xlu1 %1949 }
 0x8e0   :  { %v2029_v57 = vmul.f32 %v3735_v20, %v1950_v22 }
 0x8e2   :  { %v2045_v23 = vmul.f32 %v2029_v57, %v1927_v21 }
 0x8e3   :  { %v1945_v35 = vpop.permute.xlu1 %1944 }
 0x8e4   :  { %v2384_v45 = vadd.f32 -1.0, %v2045_v23  ;;  %v2028_v30 = vmul.f32 %v3735_v20, %v1945_v35  ;;  %v2168_v38 = vmul.f32 %v2045_v23, %v2045_v23 }
 0x8e6   :  { %v2044_v0 = vmul.f32 %v2028_v30, %v1926_v5  ;;  %v2112_v33 = vmul.f32 %v2384_v45, %v2384_v45  ;;  %v2184_v47 = vsel %vm2080_vm5, 0.0, %v2168_v38  ;;  %v2066_v38 = vadd.s32 40, %v3593_v51 }
 0x8e7   :  { %v1960_v61 = vpop.permute.xlu1 %1959 }
 0x8e8   :  { %v2383_v53 = vadd.f32 -1.0, %v2044_v0  ;;  %v2167_v32 = vmul.f32 %v2044_v0, %v2044_v0  ;;  %v2031_v60 = vmul.f32 %v3735_v20, %v1960_v61  ;;  %v2128_v14 = vsel %vm2080_vm5, %v2112_v33, 0.0 }
 0x8e9   :  { %v3935_v61 = vsub.f32 %v3613_v7, %v3616_v8  ;;  %vm2084_vm10 = vcmp.eq.s32.totalorder %v2066_v38, %v3746_v26  ;;  %v3936_v7 = vsub.f32 %v3620_v58, %v3623_v4  ;;  %v2068_v58 = vadd.s32 56, %v3593_v51 }
 0x8ea   :  { %v2111_v59 = vmul.f32 %v2383_v53, %v2383_v53  ;;  %v2183_v62 = vsel %vm2079_vm6, 0.0, %v2167_v32  ;;  %v2047_v3 = vmul.f32 %v2031_v60, %v1929_v27  ;;  %v2070_v38 = vadd.s32 72, %v3593_v51 }
 0x8eb   :  { %v2199_v2 = vadd.f32 %v2184_v47, %v2183_v62  ;;  %v1955_v10 = vpop.permute.xlu1 %1954  ;;  %v1872_v62 = vpop.permute.xlu0 %1871  ;;  %vm2086_vm12 = vcmp.eq.s32.totalorder %v2068_v58, %v3746_v26 }
 0x8ec   :  { %v2127_v48 = vsel %vm2079_vm6, %v2111_v59, 0.0  ;;  %v2030_v11 = vmul.f32 %v3735_v20, %v1955_v10  ;;  %v2386_v29 = vadd.f32 -1.0, %v2047_v3  ;;  %v2170_v22 = vmul.f32 %v2047_v3, %v2047_v3 }
 0x8ed   :  { %v2143_v9 = vadd.f32 %v2128_v14, %v2127_v48  ;;  %vm2088_vm14 = vcmp.eq.s32.totalorder %v2070_v38, %v3746_v26 }
 0x8ee   :  { %v2046_v56 = vmul.f32 %v2030_v11, %v1928_v36  ;;  %v2114_v42 = vmul.f32 %v2386_v29, %v2386_v29  ;;  %v2186_v5 = vsel %vm2082_vm8, 0.0, %v2170_v22  ;;  %v2067_v36 = vadd.s32 48, %v3593_v51 }
 0x8ef   :  { %v1970_v28 = vpop.permute.xlu1 %1969 }
 0x8f0   :  { %v2385_v21 = vadd.f32 -1.0, %v2046_v56  ;;  %v2169_v17 = vmul.f32 %v2046_v56, %v2046_v56  ;;  %v2033_v57 = vmul.f32 %v3735_v20, %v1970_v28  ;;  %v2130_v27 = vsel %vm2082_vm8, %v2114_v42, 0.0 }
 0x8f1   :  { %v3937_v56 = vsub.f32 %v3630_v13, %v3626_v24  ;;  %vm2085_vm11 = vcmp.eq.s32.totalorder %v2067_v36, %v3746_v26  ;;  %v2069_v13 = vadd.s32 64, %v3593_v51 }
 0x8f2   :  { %v2113_v23 = vmul.f32 %v2385_v21, %v2385_v21  ;;  %v2185_v43 = vsel %vm2081_vm7, 0.0, %v2169_v17  ;;  %v2049_v19 = vmul.f32 %v2033_v57, %v1931_v31 }
 0x8f3   :  { %v2200_v54 = vadd.f32 %v2199_v2, %v2185_v43  ;;  %v1965_v35 = vpop.permute.xlu1 %1964  ;;  %vm2087_vm13 = vcmp.eq.s32.totalorder %v2069_v13, %v3746_v26 }
 0x8f4   :  { %v2129_v45 = vsel %vm2081_vm7, %v2113_v23, 0.0  ;;  %v2032_v30 = vmul.f32 %v3735_v20, %v1965_v35  ;;  %v2388_v46 = vadd.f32 -1.0, %v2049_v19  ;;  %v2172_v60 = vmul.f32 %v2049_v19, %v2049_v19 }
 0x8f5   :  { %v2144_v55 = vadd.f32 %v2143_v9, %v2129_v45  ;;  %v2201_v0 = vadd.f32 %v2200_v54, %v2186_v5  ;;  %v1919_v9 = vmul.f32 %v3609_v63, %v1872_v62 }
 0x8f6   :  { %v2048_v33 = vmul.f32 %v2032_v30, %v3935_v61  ;;  %v2116_v3 = vmul.f32 %v2388_v46, %v2388_v46  ;;  %v2188_v48 = vsel %vm2084_vm10, 0.0, %v2172_v60  ;;  %v3938_v61 = vsub.f32 %v3639_v15, %v3637_v25 }
 0x8f7   :  { %v2145_v53 = vadd.f32 %v2144_v55, %v2130_v27  ;;  %v1980_v32 = vpop.permute.xlu1 %1979  ;;  %v1935_v28 = vsub.f32 %v1817_v52, %v1919_v9  ;;  %v3939_v25 = vsub.f32 %v3646_v34, %v3642_v37  ;;  %v3940_v37 = vsub.f32 %v3653_v44, %v3649_v41  ;;  %v3941_v41 = vld [vmem:[#allocation20_spill] sm:$0xff] }
 0x8f8   :  { %v2387_v12 = vadd.f32 -1.0, %v2048_v33  ;;  %v2171_v47 = vmul.f32 %v2048_v33, %v2048_v33  ;;  %v2035_v59 = vmul.f32 %v3735_v20, %v1980_v32  ;;  %v2132_v16 = vsel %vm2084_vm10, %v2116_v3, 0.0 }
 0x8f9   :  { %v3942_v44 = vsub.f32 %v3660_v49, %v3941_v41 }
 0x8fa   :  { %v2115_v50 = vmul.f32 %v2387_v12, %v2387_v12  ;;  %v2187_v2 = vsel %vm2083_vm9, 0.0, %v2171_v47  ;;  %v2051_v8 = vmul.f32 %v2035_v59, %v3936_v7  ;;  %v2071_v7 = vadd.s32 80, %v3593_v51 }
 0x8fb   :  { %v2202_v10 = vadd.f32 %v2201_v0, %v2187_v2  ;;  %v1975_v14 = vpop.permute.xlu1 %1974 }
 0x8fc   :  { %v2131_v11 = vsel %vm2083_vm9, %v2115_v50, 0.0  ;;  %v2034_v18 = vmul.f32 %v3735_v20, %v1975_v14  ;;  %v2390_v29 = vadd.f32 -1.0, %v2051_v8  ;;  %v2174_v17 = vmul.f32 %v2051_v8, %v2051_v8 }
 0x8fd   :  { %v2146_v1 = vadd.f32 %v2145_v53, %v2131_v11  ;;  %v2203_v4 = vadd.f32 %v2202_v10, %v2188_v48  ;;  %v2072_v48 = vadd.s32 88, %v3593_v51  ;;  %vm2089_vm15 = vcmp.eq.s32.totalorder %v2071_v7, %v3746_v26 }
 0x8fe   :  { %v2050_v31 = vmul.f32 %v2034_v18, %v3937_v56  ;;  %v2118_v43 = vmul.f32 %v2390_v29, %v2390_v29  ;;  %v2190_v5 = vsel %vm2086_vm12, 0.0, %v2174_v17 }
 0x8ff   :  { %v2147_v22 = vadd.f32 %v2146_v1, %v2132_v16  ;;  %v1990_v21 = vpop.permute.xlu1 %1989  ;;  %vm2090_vm0 = vcmp.eq.s32.totalorder %v2072_v48, %v3746_v26 }
 0x900   :  { %v2389_v57 = vadd.f32 -1.0, %v2050_v31  ;;  %v2173_v42 = vmul.f32 %v2050_v31, %v2050_v31  ;;  %v2037_v23 = vmul.f32 %v3735_v20, %v1990_v21  ;;  %v2134_v27 = vsel %vm2086_vm12, %v2118_v43, 0.0 }
 0x901   :  { %v1822_v31 = vmul.f32 0.125, %v3676_v40 }
 0x902   :  { %v2117_v19 = vmul.f32 %v2389_v57, %v2389_v57  ;;  %v2189_v54 = vsel %vm2085_vm11, 0.0, %v2173_v42  ;;  %v2053_v6 = vmul.f32 %v2037_v23, %v1935_v28  ;;  %v1924_v57 = vmul.f32 %v3609_v63, %v3730_v39 }
 0x903   :  { %v2204_v24 = vadd.f32 %v2203_v4, %v2189_v54  ;;  %v1985_v35 = vpop.permute.xlu1 %1984  ;;  %v2073_v23 = vadd.s32 96, %v3593_v51 }
 0x904   :  { %v2133_v45 = vsel %vm2085_vm11, %v2117_v19, 0.0  ;;  %v2036_v30 = vmul.f32 %v3735_v20, %v1985_v35  ;;  %v2392_v46 = vadd.f32 -1.0, %v2053_v6  ;;  %v2176_v60 = vmul.f32 %v2053_v6, %v2053_v6  ;;  %v3943_v35 = vld [vmem:[#allocation22_spill] sm:$0xff] }
 0x905   :  { %v2148_v55 = vadd.f32 %v2147_v22, %v2133_v45  ;;  %v2205_v0 = vadd.f32 %v2204_v24, %v2190_v5  ;;  %v2074_v6 = vadd.s32 104, %v3593_v51  ;;  %v1940_v13 = vsub.f32 %v1822_v31, %v1924_v57  ;;  %v3944_v5 = vld [vmem:[#allocation21_spill] sm:$0xff] }
 0x906   :  { %v2052_v33 = vmul.f32 %v2036_v30, %v3938_v61  ;;  %v2120_v62 = vmul.f32 %v2392_v46, %v2392_v46  ;;  %v2192_v52 = vsel %vm2088_vm14, 0.0, %v2176_v60  ;;  %v3945_v45 = vsub.f32 %v3943_v35, %v3944_v5 }
 0x907   :  { %v2149_v53 = vadd.f32 %v2148_v55, %v2134_v27  ;;  %v2000_v32 = vpop.permute.xlu1 %1999  ;;  %vm2091_vm1 = vcmp.eq.s32.totalorder %v2073_v23, %v3746_v26  ;;  %vm2092_vm2 = vcmp.eq.s32.totalorder %v2074_v6, %v3746_v26 }
 0x908   :  { %v2391_v12 = vadd.f32 -1.0, %v2052_v33  ;;  %v2175_v47 = vmul.f32 %v2052_v33, %v2052_v33  ;;  %v2039_v59 = vmul.f32 %v3735_v20, %v2000_v32  ;;  %v2136_v18 = vsel %vm2088_vm14, %v2120_v62, 0.0 }
 0x90a   :  { %v2119_v3 = vmul.f32 %v2391_v12, %v2391_v12  ;;  %v2191_v50 = vsel %vm2087_vm13, 0.0, %v2175_v47  ;;  %v2055_v15 = vmul.f32 %v2039_v59, %v3939_v25  ;;  %v2076_v59 = vadd.s32 120, %v3593_v51 }
 0x90b   :  { %v2206_v2 = vadd.f32 %v2205_v0, %v2191_v50  ;;  %v1995_v8 = vpop.permute.xlu1 %1994  ;;  %v2075_v0 = vadd.s32 112, %v3593_v51 }
 0x90c   :  { %v2135_v10 = vsel %vm2087_vm13, %v2119_v3, 0.0  ;;  %v2038_v36 = vmul.f32 %v3735_v20, %v1995_v8  ;;  %v2394_v9 = vadd.f32 -1.0, %v2055_v15  ;;  %v2178_v4 = vmul.f32 %v2055_v15, %v2055_v15 }
 0x90d   :  { %v2150_v14 = vadd.f32 %v2149_v53, %v2135_v10  ;;  %v2207_v11 = vadd.f32 %v2206_v2, %v2192_v52  ;;  %vm2093_vm3 = vcmp.eq.s32.totalorder %v2075_v0, %v3746_v26  ;;  %v3946_v10 = vld [vmem:[#allocation24_spill] sm:$0xff]  ;;  %vm2094_vm4 = vcmp.eq.s32.totalorder %v2076_v59, %v3746_v26 }
 0x90e   :  { %v2054_v34 = vmul.f32 %v2038_v36, %v3940_v37  ;;  %v2122_v28 = vmul.f32 %v2394_v9, %v2394_v9  ;;  %v2194_v40 = vsel %vm2090_vm0, 0.0, %v2178_v4  ;;  %v3947_v36 = vld [vmem:[#allocation23_spill] sm:$0xff] }
 0x90f   :  { %v2151_v1 = vadd.f32 %v2150_v14, %v2136_v18  ;;  %v2010_v58 = vpop.permute.xlu1 %2009  ;;  %v3948_v14 = vsub.f32 %v3946_v10, %v3947_v36 }
 0x910   :  { %v2393_v16 = vadd.f32 -1.0, %v2054_v34  ;;  %v2177_v29 = vmul.f32 %v2054_v34, %v2054_v34  ;;  %v2041_v56 = vmul.f32 %v3735_v20, %v2010_v58  ;;  %v2138_v63 = vsel %vm2090_vm0, %v2122_v28, 0.0 }
 0x912   :  { %v2121_v22 = vmul.f32 %v2393_v16, %v2393_v16  ;;  %v2193_v21 = vsel %vm2089_vm15, 0.0, %v2177_v29  ;;  %v2057_v17 = vmul.f32 %v2041_v56, %v3942_v44 }
 0x913   :  { %v2208_v42 = vadd.f32 %v2207_v11, %v2193_v21  ;;  %v2005_v43 = vpop.permute.xlu1 %2004 }
 0x914   :  { %v2137_v19 = vsel %vm2089_vm15, %v2121_v22, 0.0  ;;  %v2040_v54 = vmul.f32 %v3735_v20, %v2005_v43  ;;  %v2396_v39 = vadd.f32 -1.0, %v2057_v17  ;;  %v2180_v55 = vmul.f32 %v2057_v17, %v2057_v17 }
 0x915   :  { %v2152_v24 = vadd.f32 %v2151_v1, %v2137_v19  ;;  %v2209_v49 = vadd.f32 %v2208_v42, %v2194_v40 }
 0x916   :  { %v2056_v30 = vmul.f32 %v2040_v54, %v3945_v45  ;;  %v2124_v53 = vmul.f32 %v2396_v39, %v2396_v39  ;;  %v2196_v62 = vsel %vm2092_vm2, 0.0, %v2180_v55 }
 0x917   :  { %v2015_v38 = vpop.permute.xlu1 %2014  ;;  %v2153_v27 = vadd.f32 %v2152_v24, %v2138_v63 }
 0x918   :  { %v2395_v46 = vadd.f32 -1.0, %v2056_v30  ;;  %v2179_v61 = vmul.f32 %v2056_v30, %v2056_v30  ;;  %v2042_v33 = vmul.f32 %v3735_v20, %v2015_v38  ;;  %v2140_v48 = vsel %vm2092_vm2, %v2124_v53, 0.0 }
 0x91a   :  { %v2123_v32 = vmul.f32 %v2395_v46, %v2395_v46  ;;  %v2195_v60 = vsel %vm2091_vm1, 0.0, %v2179_v61  ;;  %v2058_v12 = vmul.f32 %v2042_v33, %v1940_v13 }
 0x91b   :  { %v2020_v47 = vpop.permute.xlu1 %2019  ;;  %v2210_v3 = vadd.f32 %v2209_v49, %v2195_v60 }
 0x91c   :  { %v2139_v50 = vsel %vm2091_vm1, %v2123_v32, 0.0  ;;  %v2397_v25 = vadd.f32 -1.0, %v2058_v12  ;;  %v2181_v15 = vmul.f32 %v2058_v12, %v2058_v12  ;;  %v2043_v2 = vmul.f32 %v3735_v20, %v2020_v47 }
 0x91d   :  { %v2154_v7 = vadd.f32 %v2153_v27, %v2139_v50  ;;  %v2211_v8 = vadd.f32 %v2210_v3, %v2196_v62 }
 0x91e   :  { %v2125_v52 = vmul.f32 %v2397_v25, %v2397_v25  ;;  %v2059_v51 = vmul.f32 %v2043_v2, %v3948_v14  ;;  %v2197_v11 = vsel %vm2093_vm3, 0.0, %v2181_v15 }
 0x91f   :  { %v2155_v18 = vadd.f32 %v2154_v7, %v2140_v48  ;;  %v2212_v9 = vadd.f32 %v2211_v8, %v2197_v11 }
 0x920   :  { %v2398_v37 = vadd.f32 -1.0, %v2059_v51  ;;  %v2141_v20 = vsel %vm2093_vm3, %v2125_v52, 0.0  ;;  %v2182_v34 = vmul.f32 %v2059_v51, %v2059_v51 }
 0x921   :  { %v2156_v1 = vadd.f32 %v2155_v18, %v2141_v20 }
 0x922   :  { %v2126_v58 = vmul.f32 %v2398_v37, %v2398_v37  ;;  %v2198_v4 = vsel %vm2094_vm4, 0.0, %v2182_v34 }
 0x923   :  { %v2213_v16 = vadd.f32 %v2212_v9, %v2198_v4 }
 0x924   :  { %v2142_v29 = vsel %vm2094_vm4, %v2126_v58, 0.0 }
 0x925   :  { %v2157_v56 = vadd.f32 %v2156_v1, %v2142_v29 }
 0x927   :  { %2158 = vadd.xlane.f32.xlu1 %v2157_v56 }
 0x92b   :  { %2214 = vadd.xlane.f32.xlu1 %v2213_v16 }
 0x92c   :  { %2831 = shalt.err (!%p2828_p4)
}
 0x92d   :  { %2246 = dma.vmem_to_hbm [thread:$0]  %s2244_s21, 128, %s3910_s15, [#allocation11]  }
 0x92e   :  { %s2840_s26 = scalar_lea.vmem %s2234_s2, 128  ;;  %p2845_p6 = scmp.lt.s32.totalorder %s2234_s2, %s2234_s2 }
 0x92f   :  { %p2841_p5 = scmp.ne.s32.totalorder %s2234_s2, %s2840_s26  ;;  %p2846_p7 = scmp.lt.s32.totalorder %s2840_s26, %s2840_s26 }
 0x931   :  { %p2847_p8 = por %p2846_p7, %p2845_p6 }
 0x933   :  { %p2848_p9 = pnand %p2847_p8, %p2841_p5 }
 0x935   :  { %2851 = shalt.err (!%p2848_p9)
}
 0x936   :  { %2236 = dma.vmem_to_hbm [thread:$0]  %s2234_s2, 128, %s3909_s14, [#allocation8]  }
 0x937   :  { %s2922_s29 = smov [#allocation12]   ;;  %s2923_s0 = smov [#allocation13]  }
 0x938   :  { %s2253_s30 = sshll.u32 %s2922_s29, 4  ;;  %s2263_s10 = sshll.u32 %s2923_s0, 4  ;;  %s2254_s30 = int_to_ptr.vmem [resolvable:$true] %s2253_s30  ;;  %s2264_s10 = int_to_ptr.vmem [resolvable:$true] %s2263_s10 }
 0x939   :  { %s2860_s3 = scalar_lea.vmem %s2254_s30, 128  ;;  %p2865_p11 = scmp.lt.s32.totalorder %s2254_s30, %s2254_s30 }
 0x93a   :  { %p2861_p10 = scmp.ne.s32.totalorder %s2254_s30, %s2860_s3  ;;  %p2866_p12 = scmp.lt.s32.totalorder %s2860_s3, %s2860_s3 }
 0x93c   :  { %p2867_p13 = por %p2866_p12, %p2865_p11 }
 0x93e   :  { %p2868_p0 = pnand %p2867_p13, %p2861_p10 }
 0x940   :  { %2871 = shalt.err (!%p2868_p0)
}
 0x941   :  { %2256 = dma.vmem_to_hbm [thread:$0]  %s2254_s30, 128, %s3911_s16, [#allocation11]  }
 0x942   :  { %s2880_s4 = scalar_lea.vmem %s2264_s10, 128  ;;  %p2885_p2 = scmp.lt.s32.totalorder %s2264_s10, %s2264_s10 }
 0x943   :  { %p2881_p1 = scmp.ne.s32.totalorder %s2264_s10, %s2880_s4  ;;  %p2886_p3 = scmp.lt.s32.totalorder %s2880_s4, %s2880_s4 }
 0x945   :  { %p2887_p4 = por %p2886_p3, %p2885_p2 }
 0x947   :  { %p2888_p5 = pnand %p2887_p4, %p2881_p1 }
 0x949   :  { %2891 = shalt.err (!%p2888_p5)
}
 0x94a   :  { %2266 = dma.vmem_to_hbm [thread:$0]  %s2264_s10, 128, %s3912_s17, [#allocation14]  }
 0x94b   :  { %s2924_s12 = smov [#allocation15]  }
 0x9b0   :  { %v2159_v26 = vpop.xlane.xlu1 %2158 }
 0x9b1   :  { %v2160_v31 = vrot.slane %v2159_v26, 4 }
 0x9b3   :  { %v2161_v28 = vadd.f32 %v2160_v31, %v2159_v26 }
 0x9b4   :  { %v2215_v22 = vpop.xlane.xlu1 %2214 }
 0x9b5   :  { %v2162_v21 = vrot.slane %v2161_v28, 2  ;;  %v2216_v41 = vrot.slane %v2215_v22, 4 }
 0x9b7   :  { %v2217_v44 = vadd.f32 %v2216_v41, %v2215_v22  ;;  %v2163_v17 = vadd.f32 %v2162_v21, %v2161_v28 }
 0x9b9   :  { %v2218_v57 = vrot.slane %v2217_v44, 2  ;;  %v2164_v42 = vrot.slane %v2163_v17, 1 }
 0x9bb   :  { %v2219_v23 = vadd.f32 %v2218_v57, %v2217_v44  ;;  %v2165_v43 = vadd.f32 %v2164_v42, %v2163_v17 }
 0x9bd   :  { %2744 = vpush %v2165_v43  ;;  %v2220_v40 = vrot.slane %v2219_v23, 1 }
 0x9bf   :  { %v2221_v19 = vadd.f32 %v2220_v40, %v2219_v23 }
 0x9c1   :  { %2746 = vpush %v2221_v19 }
 0x9ee   :  { %s2745_s16 = spop %2744 }
 0x9f2   :  { %s2747_s19 = spop %2746 }
 0x9f3   :  { %s2223_s1 = smul.f32 0.0039, %s2747_s19 }
 0x9f5   :  { %s2224_s17 = sadd.f32 %s2745_s16, %s2223_s1 }
 0x9f7   :  { %2226 = sst [smem:[#allocation15]] %s2224_s17 }
 0x9f8   :  { %2274 = dma.smem_to_hbm %s2924_s12, 16, %s3913_s18, [#allocation9]  }
 0x9f9   :  { %2908 = dma.done.wait [#allocation8], 128  }
 0x9fa   :  { %2909 = vsyncadd [#allocation8], 4294967168 }
 0x9fb   :  { %2910 = dma.done.wait [#allocation11], 256  }
 0x9fc   :  { %2911 = vsyncadd [#allocation11], 4294967040 }
 0x9fd   :  { %2912 = dma.done.wait [#allocation14], 128  }
 0x9fe   :  { %2913 = vsyncadd [#allocation14], 4294967168 }
 0x9ff   :  { %2914 = dma.done.wait [#allocation9], 16  }
 0xa00   :  { %2915 = vsyncadd [#allocation9], 4294967280 }
 0xa01   :  { %2290 = sfence }
 0xa02   :  { %2291 = vsyncpa [#allocation8], 1 }
 0xa03   :  { %2292 = vsyncpa [#allocation11], 1 }
 0xa04   :  { %2293 = vsyncpa [#allocation14], 1 }
 0xa05   :  { %2294 = vsyncpa [#allocation9], 1 }

</bundles_post_ra>
